<compile_context>
chip_gen: v7x
topology: tpu7x:2x2x1
jax: 0.10.0
libtpu: 0.0.40
codegen_flags: <defaults>
</compile_context>

<pallas_src>
import functools

import jax
import jax.numpy as jnp
from jax.experimental import pallas as pl
from jax.experimental.pallas import tpu as pltpu


def _round_up(n, m):
    return ((n + m - 1) // m) * m


def _band_rows(H2, W2):
    """Stage-2/3 row-band height: M = TH*W2 >= 256 when possible, <= ~8 bands."""
    target = max(1, -(-256 // W2), -(-H2 // 8))
    for t in range(min(target, H2), H2 + 1):
        if H2 % t == 0:
            return t
    return H2


def _vmem_limit_bytes(H2, W2, D, C1p, C2p, th, out_itemsize):
    """Rough per-grid-step VMEM footprint (with pipelining buffers + headroom)."""
    lane = 128
    hw = H2 * W2
    d_vmem = max(_round_up(D, lane), lane)
    in_block = 2 * 4 * hw * lane * 2                    # xcol block (K lane-padded), double-buffered
    out_block = 2 * hw * d_vmem * out_itemsize          # output block, double-buffered
    scratch = 4 * (H2 + 1) * (W2 + 1) * C1p * 2         # bf16 parity-split stage-1 activations
    weights = 2 * 2 * (32 * C1p + 9 * C1p * C2p + C2p * d_vmem)
    temps = hw * C1p * 6 + th * W2 * (9 * C1p * 2 + C2p * 6 + d_vmem * 8)
    est = int(1.3 * (in_block + out_block + scratch + weights + temps))
    # Stay >= the default scoped limit; common configs land <= 56 MiB which fits
    # v7x's 64 MiB physical VMEM with Mosaic headroom (bigger configs need
    # output band tiling on v7x but still fit v5e/v6e's 128 MiB).
    return min(max(est, 32 * 1024 * 1024), 100 * 1024 * 1024)


# --------------------------------------------------------------------------
# Fused ConvStem kernel (one grid step == one batch element)
# --------------------------------------------------------------------------
def _conv_stem_kernel(xcol_ref, w1_ref, s1_ref, b1_ref, w2_ref, s2_ref, b2_ref,
                      w3_ref, b3_ref, o_ref,
                      y_ee_ref, y_eo_ref, y_oe_ref, y_oo_ref, *, band_rows):
    H2, W2, D = o_ref.shape
    C1p = y_ee_ref.shape[-1]

    w1 = w1_ref[...]                       # (32, C1p)      bf16
    w2 = w2_ref[...]                       # (9*C1p, C2p)   bf16
    w3 = w3_ref[...]                       # (C2p, D)       bf16
    s1 = s1_ref[...]                       # (1, C1p)       f32 folded BN scale
    b1 = b1_ref[...]                       # (1, C1p)       f32 folded BN shift
    s2 = s2_ref[...]
    b2 = b2_ref[...]
    b3 = b3_ref[...]                       # (1, D)         f32 conv bias

    # --- zero ONLY the conv-padding border of the scratch (interior is fully
    #     overwritten below; full-buffer zeroing was pure vst overhead). -------
    zcol = jnp.zeros((H2, 1, C1p), jnp.bfloat16)
    y_eo_ref[:, 0:1] = zcol                                  # left pad column
    y_oo_ref[1:, 0:1] = zcol
    y_oe_ref[0:1, :] = jnp.zeros((1, W2, C1p), jnp.bfloat16)      # top pad row
    y_oo_ref[0:1, :] = jnp.zeros((1, W2 + 1, C1p), jnp.bfloat16)

    # --- stage 1: conv3x3 stride2 + BN + ReLU as 4 whole-image matmuls --------
    # xcol_ref[k] holds the (H2*W2, 32) im2col patches of stage-1 outputs with
    # row parity k//2 and col parity k%2 (pre-sorted by the wrapper).
    def stage1(k):
        patches = xcol_ref[k]                                   # (H2*W2, 32) bf16
        y = jnp.dot(patches, w1, preferred_element_type=jnp.float32)
        y = jnp.maximum(y * s1 + b1, 0.0)                       # folded BN + ReLU
        return y.astype(jnp.bfloat16).reshape(H2, W2, C1p)

    y_ee_ref[...] = stage1(0)              # even row, even col
    y_eo_ref[:, 1:] = stage1(1)            # even row, odd  col (col 0 is zero pad)
    y_oe_ref[1:, :] = stage1(2)            # odd  row, even col (row 0 is zero pad)
    y_oo_ref[1:, 1:] = stage1(3)           # odd  row, odd  col

    # --- stage 2 (conv3x3 s2 + BN + ReLU) fused with stage 3 (1x1 + bias) -----
    # For an output band of rows [r0, r0+rr) every tap (kh, kw) is a contiguous
    # slice of one parity buffer; concat order matches w2's (kh, kw, c1) K order.
    for r0 in range(0, H2, band_rows):
        rr = min(band_rows, H2 - r0)
        taps = [
            y_oo_ref[r0:r0 + rr, 0:W2],            # (kh=0, kw=0)
            y_oe_ref[r0:r0 + rr, :],               # (kh=0, kw=1)
            y_oo_ref[r0:r0 + rr, 1:W2 + 1],        # (kh=0, kw=2)
            y_eo_ref[r0:r0 + rr, 0:W2],            # (kh=1, kw=0)
            y_ee_ref[r0:r0 + rr, :],               # (kh=1, kw=1)
            y_eo_ref[r0:r0 + rr, 1:W2 + 1],        # (kh=1, kw=2)
            y_oo_ref[r0 + 1:r0 + rr + 1, 0:W2],    # (kh=2, kw=0)
            y_oe_ref[r0 + 1:r0 + rr + 1, :],       # (kh=2, kw=1)
            y_oo_ref[r0 + 1:r0 + rr + 1, 1:W2 + 1],  # (kh=2, kw=2)
        ]
        p2 = jnp.concatenate(taps, axis=-1)        # (rr, W2, 9*C1p) bf16, lane-aligned
        p2 = p2.reshape(rr * W2, 9 * C1p)
        y2 = jnp.dot(p2, w2, preferred_element_type=jnp.float32)
        y2 = jnp.maximum(y2 * s2 + b2, 0.0).astype(jnp.bfloat16)
        y3 = jnp.dot(y2, w3, preferred_element_type=jnp.float32) + b3
        o_ref[r0:r0 + rr] = y3.reshape(rr, W2, D).astype(o_ref.dtype)


# --------------------------------------------------------------------------
# Wrapper: layout prep (stage-1 im2col, parity sort, channel padding) + call
# --------------------------------------------------------------------------
def conv_stem_forward(x_nchw, p, out_dtype=jnp.float32):
    """x_nchw: (B, 3, H, W)  ->  (B, (H//4)*(W//4), embed_dim)."""
    B, C, H, W = x_nchw.shape
    assert C == 3, "ConvStem's first conv is hard-wired to 3 input channels"
    assert H % 4 == 0 and W % 4 == 0, "ConvStem (patch_size=4) needs H, W % 4 == 0"
    H1, W1 = H // 2, W // 2
    H2, W2 = H // 4, W // 4
    C1 = p["w1"].shape[-1]
    C2 = p["w2"].shape[-1]
    D = p["w3"].shape[-1]
    C1p = _round_up(C1, 128)               # lane-align hidden channels
    C2p = _round_up(C2, 128)
    K1, K1p = 27, 32                       # stage-1 im2col depth (3*3*3 -> 32)

    # ---- stage-1 im2col in the wrapper (bf16), pre-sorted by output parity ----
    x = jnp.transpose(x_nchw, (0, 2, 3, 1))                        # NHWC
    xp = jnp.pad(x, ((0, 0), (1, 1), (1, 1), (0, 0)))              # conv pad 1
    taps = []
    for kh in range(3):
        for kw in range(3):
            taps.append(xp[:, kh:kh + H:2, kw:kw + W:2, :])        # (B, H1, W1, 3)
    cols = jnp.stack(taps, axis=3).reshape(B, H1, W1, K1)          # (kh, kw, cin)
    cols = jnp.pad(cols, ((0, 0), (0, 0), (0, 0), (0, K1p - K1)))
    cols = cols.reshape(B, H2, 2, W2, 2, K1p)
    cols = jnp.transpose(cols, (0, 2, 4, 1, 3, 5))                 # (B, 2, 2, H2, W2, K1p)
    xcol = cols.reshape(B, 4, H2 * W2, K1p).astype(jnp.bfloat16)

    # ---- weights: (K, N) matmul form, zero-padded channels, bf16 for the MXU ---
    w1m = jnp.pad(p["w1"].reshape(K1, C1),
                  ((0, K1p - K1), (0, C1p - C1))).astype(jnp.bfloat16)        # (32, C1p)
    w2m = jnp.pad(p["w2"], ((0, 0), (0, 0), (0, C1p - C1), (0, C2p - C2)))
    w2m = w2m.reshape(9 * C1p, C2p).astype(jnp.bfloat16)                      # (9*C1p, C2p)
    w3m = jnp.pad(p["w3"], ((0, C2p - C2), (0, 0))).astype(jnp.bfloat16)      # (C2p, D)
    s1 = jnp.pad(p["scale1"], (0, C1p - C1)).reshape(1, C1p).astype(jnp.float32)
    b1 = jnp.pad(p["shift1"], (0, C1p - C1)).reshape(1, C1p).astype(jnp.float32)
    s2 = jnp.pad(p["scale2"], (0, C2p - C2)).reshape(1, C2p).astype(jnp.float32)
    b2 = jnp.pad(p["shift2"], (0, C2p - C2)).reshape(1, C2p).astype(jnp.float32)
    b3 = p["b3"].reshape(1, D).astype(jnp.float32)

    th = _band_rows(H2, W2)
    out_itemsize = jnp.dtype(out_dtype).itemsize
    vmem_limit = _vmem_limit_bytes(H2, W2, D, C1p, C2p, th, out_itemsize)

    out = pl.pallas_call(
        functools.partial(_conv_stem_kernel, band_rows=th),
        out_shape=jax.ShapeDtypeStruct((B, H2, W2, D), out_dtype),
        grid_spec=pltpu.PrefetchScalarGridSpec(
            num_scalar_prefetch=0,
            grid=(B,),
            in_specs=[
                pl.BlockSpec((None, 4, H2 * W2, K1p), lambda b: (b, 0, 0, 0)),
                pl.BlockSpec((K1p, C1p), lambda b: (0, 0)),
                pl.BlockSpec((1, C1p), lambda b: (0, 0)),
                pl.BlockSpec((1, C1p), lambda b: (0, 0)),
                pl.BlockSpec((9 * C1p, C2p), lambda b: (0, 0)),
                pl.BlockSpec((1, C2p), lambda b: (0, 0)),
                pl.BlockSpec((1, C2p), lambda b: (0, 0)),
                pl.BlockSpec((C2p, D), lambda b: (0, 0)),
                pl.BlockSpec((1, D), lambda b: (0, 0)),
            ],
            out_specs=pl.BlockSpec((None, H2, W2, D), lambda b: (b, 0, 0, 0)),
            scratch_shapes=[
                pltpu.VMEM((H2, W2, C1p), jnp.bfloat16),          # even row, even col
                pltpu.VMEM((H2, W2 + 1, C1p), jnp.bfloat16),      # even row, odd  col
                pltpu.VMEM((H2 + 1, W2, C1p), jnp.bfloat16),      # odd  row, even col
                pltpu.VMEM((H2 + 1, W2 + 1, C1p), jnp.bfloat16),  # odd  row, odd  col
            ],
        ),
        compiler_params=pltpu.CompilerParams(
            dimension_semantics=("parallel",),
            vmem_limit_bytes=vmem_limit,
        ),
    )(xcol, w1m, s1, b1, w2m, s2, b2, w3m, b3)

    # flatten(2).transpose(1, 2) equivalent — free contiguous reshape.
    return out.reshape(B, H2 * W2, D)


# --------------------------------------------------------------------------
# ConvStem parameters (deterministic synthetic init, BN folded for inference)
# --------------------------------------------------------------------------
def init_conv_stem_params(key, in_chans=3, embed_dim=32, eps=1e-5):
    assert embed_dim % 8 == 0
    c1, c2 = embed_dim // 8, embed_dim // 4
    ks = jax.random.split(key, 8)
    p = {}
    # conv weights stored as (kh, kw, Cin, Cout) to match the kernel's K ordering
    p["w1"] = 0.1 * jax.random.normal(ks[0], (3, 3, in_chans, c1), jnp.float32)
    p["w2"] = 0.1 * jax.random.normal(ks[1], (3, 3, c1, c2), jnp.float32)
    p["w3"] = 0.1 * jax.random.normal(ks[2], (c2, embed_dim), jnp.float32)
    p["b3"] = 0.1 * jax.random.normal(ks[3], (embed_dim,), jnp.float32)
    # BatchNorm (inference): gamma, beta, running_mean, running_var
    g1 = 1.0 + 0.05 * jax.random.normal(ks[4], (c1,), jnp.float32)
    be1 = 0.05 * jax.random.normal(ks[5], (c1,), jnp.float32)
    g2 = 1.0 + 0.05 * jax.random.normal(ks[6], (c2,), jnp.float32)
    be2 = 0.05 * jax.random.normal(ks[7], (c2,), jnp.float32)
    rm1, rv1 = jnp.zeros((c1,)), jnp.ones((c1,))
    rm2, rv2 = jnp.zeros((c2,)), jnp.ones((c2,))
    p["scale1"] = g1 / jnp.sqrt(rv1 + eps)
    p["shift1"] = be1 - rm1 * p["scale1"]
    p["scale2"] = g2 / jnp.sqrt(rv2 + eps)
    p["shift2"] = be2 - rm2 * p["scale2"]
    return p


# --------------------------------------------------------------------------
# Pure-JAX reference (lax conv, NCHW, f32) for the correctness check
# --------------------------------------------------------------------------
def conv_stem_reference(x_nchw, p):
    def conv3x3_s2(x, w_khwcio):
        w = jnp.transpose(w_khwcio, (3, 2, 0, 1))  # OIHW
        return jax.lax.conv_general_dilated(
            x, w, window_strides=(2, 2), padding=((1, 1), (1, 1)),
            dimension_numbers=("NCHW", "OIHW", "NCHW"),
            precision=jax.lax.Precision.HIGHEST)

    y = conv3x3_s2(x_nchw, p["w1"])
    y = y * p["scale1"][None, :, None, None] + p["shift1"][None, :, None, None]
    y = jnp.maximum(y, 0.0)
    y = conv3x3_s2(y, p["w2"])
    y = y * p["scale2"][None, :, None, None] + p["shift2"][None, :, None, None]
    y = jnp.maximum(y, 0.0)
    y = jnp.einsum("bchw,cd->bdhw", y, p["w3"],
                   precision=jax.lax.Precision.HIGHEST)
    y = y + p["b3"][None, :, None, None]
    B, D, Ho, Wo = y.shape
    return jnp.transpose(y.reshape(B, D, Ho * Wo), (0, 2, 1))


if __name__ == "__main__":
    key = jax.random.PRNGKey(0)
    kx, kp = jax.random.split(key)

    B, C, H, W = 2, 3, 16, 16            # img_size=16, in_chans=3
    embed_dim = 32                        # divisible by 8
    x = jax.random.normal(kx, (B, C, H, W), jnp.float32)
    params = init_conv_stem_params(kp, in_chans=C, embed_dim=embed_dim)

    fwd = jax.jit(conv_stem_forward)
    out = jax.block_until_ready(fwd(x, params))

    assert out.shape == (B, (H // 4) * (W // 4), embed_dim), out.shape

    ref = jax.block_until_ready(conv_stem_reference(x, params))
    # bf16 MXU operands / bf16 stage-1 scratch vs f32 HIGHEST-precision reference.
    err = float(jnp.max(jnp.abs(out - ref)))
    assert jnp.allclose(out, ref, rtol=5e-2, atol=5e-2), f"max abs diff = {err}"

    print("KERNEL_OK")
</pallas_src>

<mosaic_0001>
module attributes {stable_mosaic.version = 11 : i64} {
  func.func @_conv_stem_kernel(%arg0: i32, %arg1: memref<1x4x16x32xbf16, #tpu.memory_space<vmem>>, %arg2: memref<32x128xbf16, #tpu.memory_space<vmem>>, %arg3: memref<1x128xf32, #tpu.memory_space<vmem>>, %arg4: memref<1x128xf32, #tpu.memory_space<vmem>>, %arg5: memref<1152x128xbf16, #tpu.memory_space<vmem>>, %arg6: memref<1x128xf32, #tpu.memory_space<vmem>>, %arg7: memref<1x128xf32, #tpu.memory_space<vmem>>, %arg8: memref<128x32xbf16, #tpu.memory_space<vmem>>, %arg9: memref<1x32xf32, #tpu.memory_space<vmem>>, %arg10: memref<1x4x4x32xf32, #tpu.memory_space<vmem>>, %arg11: memref<4x4x128xbf16, #tpu.memory_space<vmem>>, %arg12: memref<4x5x128xbf16, #tpu.memory_space<vmem>>, %arg13: memref<5x4x128xbf16, #tpu.memory_space<vmem>>, %arg14: memref<5x5x128xbf16, #tpu.memory_space<vmem>>) attributes {dimension_semantics = [#tpu.dimension_semantics<parallel>], iteration_bounds = array<i64: 2>, scalar_prefetch = 0 : i64, scratch_operands = 4 : i64, tpu.core_type = #tpu.core_type<tc>, window_params = [{transform_indices = @transform_0, window_bounds = array<i64: 1, 4, 16, 32>}, {pipeline_mode = #tpu.pipeline_mode<synchronous>, transform_indices = @transform_1, window_bounds = array<i64: 32, 128>}, {pipeline_mode = #tpu.pipeline_mode<synchronous>, transform_indices = @transform_2, window_bounds = array<i64: 1, 128>}, {pipeline_mode = #tpu.pipeline_mode<synchronous>, transform_indices = @transform_3, window_bounds = array<i64: 1, 128>}, {pipeline_mode = #tpu.pipeline_mode<synchronous>, transform_indices = @transform_4, window_bounds = array<i64: 1152, 128>}, {pipeline_mode = #tpu.pipeline_mode<synchronous>, transform_indices = @transform_5, window_bounds = array<i64: 1, 128>}, {pipeline_mode = #tpu.pipeline_mode<synchronous>, transform_indices = @transform_6, window_bounds = array<i64: 1, 128>}, {pipeline_mode = #tpu.pipeline_mode<synchronous>, transform_indices = @transform_7, window_bounds = array<i64: 128, 32>}, {pipeline_mode = #tpu.pipeline_mode<synchronous>, transform_indices = @transform_8, window_bounds = array<i64: 1, 32>}, {transform_indices = @transform_9, window_bounds = array<i64: 1, 4, 4, 32>}]} {
    %c0 = arith.constant 0 : index
    %c0_0 = arith.constant 0 : index
    %0 = vector.load %arg2[%c0, %c0_0] : memref<32x128xbf16, #tpu.memory_space<vmem>>, vector<32x128xbf16>
    %c0_1 = arith.constant 0 : index
    %c0_2 = arith.constant 0 : index
    %1 = vector.load %arg5[%c0_1, %c0_2] : memref<1152x128xbf16, #tpu.memory_space<vmem>>, vector<1152x128xbf16>
    %c0_3 = arith.constant 0 : index
    %c0_4 = arith.constant 0 : index
    %2 = vector.load %arg8[%c0_3, %c0_4] : memref<128x32xbf16, #tpu.memory_space<vmem>>, vector<128x32xbf16>
    %c0_5 = arith.constant 0 : index
    %c0_6 = arith.constant 0 : index
    %3 = vector.load %arg3[%c0_5, %c0_6] : memref<1x128xf32, #tpu.memory_space<vmem>>, vector<1x128xf32>
    %c0_7 = arith.constant 0 : index
    %c0_8 = arith.constant 0 : index
    %4 = vector.load %arg4[%c0_7, %c0_8] : memref<1x128xf32, #tpu.memory_space<vmem>>, vector<1x128xf32>
    %c0_9 = arith.constant 0 : index
    %c0_10 = arith.constant 0 : index
    %5 = vector.load %arg6[%c0_9, %c0_10] : memref<1x128xf32, #tpu.memory_space<vmem>>, vector<1x128xf32>
    %c0_11 = arith.constant 0 : index
    %c0_12 = arith.constant 0 : index
    %6 = vector.load %arg7[%c0_11, %c0_12] : memref<1x128xf32, #tpu.memory_space<vmem>>, vector<1x128xf32>
    %c0_13 = arith.constant 0 : index
    %c0_14 = arith.constant 0 : index
    %7 = vector.load %arg9[%c0_13, %c0_14] : memref<1x32xf32, #tpu.memory_space<vmem>>, vector<1x32xf32>
    %cst = arith.constant 0.000000e+00 : bf16
    %8 = vector.broadcast %cst : bf16 to vector<4x1x128xbf16>
    %c0_15 = arith.constant 0 : index
    %c0_16 = arith.constant 0 : index
    %c0_17 = arith.constant 0 : index
    %9 = vector.load %arg12[%c0_15, %c0_16, %c0_17] : memref<4x5x128xbf16, #tpu.memory_space<vmem>>, vector<4x1x128xbf16>
    tpu.vector_store %arg12[%c0_15, %c0_16, %c0_17], %8 {strides = array<i32>} : memref<4x5x128xbf16, #tpu.memory_space<vmem>>, vector<4x1x128xbf16>,
    %c1 = arith.constant 1 : index
    %c0_18 = arith.constant 0 : index
    %c0_19 = arith.constant 0 : index
    %10 = vector.load %arg14[%c1, %c0_18, %c0_19] : memref<5x5x128xbf16, #tpu.memory_space<vmem>>, vector<4x1x128xbf16>
    tpu.vector_store %arg14[%c1, %c0_18, %c0_19], %8 {strides = array<i32>} : memref<5x5x128xbf16, #tpu.memory_space<vmem>>, vector<4x1x128xbf16>,
    %cst_20 = arith.constant 0.000000e+00 : bf16
    %11 = vector.broadcast %cst_20 : bf16 to vector<1x4x128xbf16>
    %c0_21 = arith.constant 0 : index
    %c0_22 = arith.constant 0 : index
    %c0_23 = arith.constant 0 : index
    %12 = vector.load %arg13[%c0_21, %c0_22, %c0_23] : memref<5x4x128xbf16, #tpu.memory_space<vmem>>, vector<1x4x128xbf16>
    tpu.vector_store %arg13[%c0_21, %c0_22, %c0_23], %11 {strides = array<i32>} : memref<5x4x128xbf16, #tpu.memory_space<vmem>>, vector<1x4x128xbf16>,
    %cst_24 = arith.constant 0.000000e+00 : bf16
    %13 = vector.broadcast %cst_24 : bf16 to vector<1x5x128xbf16>
    %c0_25 = arith.constant 0 : index
    %c0_26 = arith.constant 0 : index
    %c0_27 = arith.constant 0 : index
    %14 = vector.load %arg14[%c0_25, %c0_26, %c0_27] : memref<5x5x128xbf16, #tpu.memory_space<vmem>>, vector<1x5x128xbf16>
    tpu.vector_store %arg14[%c0_25, %c0_26, %c0_27], %13 {strides = array<i32>} : memref<5x5x128xbf16, #tpu.memory_space<vmem>>, vector<1x5x128xbf16>,
    %c0_28 = arith.constant 0 : index
    %c0_29 = arith.constant 0 : index
    %c0_30 = arith.constant 0 : index
    %c0_31 = arith.constant 0 : index
    %15 = vector.load %arg1[%c0_28, %c0_29, %c0_30, %c0_31] : memref<1x4x16x32xbf16, #tpu.memory_space<vmem>>, vector<1x1x16x32xbf16>
    %16 = vector.shape_cast %15 : vector<1x1x16x32xbf16> to vector<16x32xbf16>
    %cst_32 = arith.constant dense<0.000000e+00> : vector<16x128xf32>
    %17 = tpu.matmul %16, %0, %cst_32 {dimension_numbers = #tpu.dot_dimension_numbers<[1], [0], [0], [1], [0, 0, 1, 1], [], []>} : vector<16x32xbf16>, vector<32x128xbf16>, vector<16x128xf32> -> vector<16x128xf32>
    %18 = vector.broadcast %3 : vector<1x128xf32> to vector<16x128xf32>
    %19 = arith.mulf %17, %18 : vector<16x128xf32>
    %20 = vector.broadcast %4 : vector<1x128xf32> to vector<16x128xf32>
    %21 = arith.addf %19, %20 : vector<16x128xf32>
    %cst_33 = arith.constant 0.000000e+00 : f32
    %22 = vector.broadcast %cst_33 : f32 to vector<16x128xf32>
    %23 = arith.maximumf %21, %22 : vector<16x128xf32>
    %24 = arith.truncf %23 : vector<16x128xf32> to vector<16x128xbf16>
    %25 = vector.shape_cast %24 : vector<16x128xbf16> to vector<4x4x128xbf16>
    %c0_34 = arith.constant 0 : index
    %c0_35 = arith.constant 0 : index
    %c0_36 = arith.constant 0 : index
    %26 = vector.load %arg11[%c0_34, %c0_35, %c0_36] : memref<4x4x128xbf16, #tpu.memory_space<vmem>>, vector<4x4x128xbf16>
    tpu.vector_store %arg11[%c0_34, %c0_35, %c0_36], %25 {strides = array<i32>} : memref<4x4x128xbf16, #tpu.memory_space<vmem>>, vector<4x4x128xbf16>,
    %c0_37 = arith.constant 0 : index
    %c1_38 = arith.constant 1 : index
    %c0_39 = arith.constant 0 : index
    %c0_40 = arith.constant 0 : index
    %27 = vector.load %arg1[%c0_37, %c1_38, %c0_39, %c0_40] : memref<1x4x16x32xbf16, #tpu.memory_space<vmem>>, vector<1x1x16x32xbf16>
    %28 = vector.shape_cast %27 : vector<1x1x16x32xbf16> to vector<16x32xbf16>
    %cst_41 = arith.constant dense<0.000000e+00> : vector<16x128xf32>
    %29 = tpu.matmul %28, %0, %cst_41 {dimension_numbers = #tpu.dot_dimension_numbers<[1], [0], [0], [1], [0, 0, 1, 1], [], []>} : vector<16x32xbf16>, vector<32x128xbf16>, vector<16x128xf32> -> vector<16x128xf32>
    %30 = vector.broadcast %3 : vector<1x128xf32> to vector<16x128xf32>
    %31 = arith.mulf %29, %30 : vector<16x128xf32>
    %32 = vector.broadcast %4 : vector<1x128xf32> to vector<16x128xf32>
    %33 = arith.addf %31, %32 : vector<16x128xf32>
    %cst_42 = arith.constant 0.000000e+00 : f32
    %34 = vector.broadcast %cst_42 : f32 to vector<16x128xf32>
    %35 = arith.maximumf %33, %34 : vector<16x128xf32>
    %36 = arith.truncf %35 : vector<16x128xf32> to vector<16x128xbf16>
    %37 = vector.shape_cast %36 : vector<16x128xbf16> to vector<4x4x128xbf16>
    %c0_43 = arith.constant 0 : index
    %c1_44 = arith.constant 1 : index
    %c0_45 = arith.constant 0 : index
    %38 = vector.load %arg12[%c0_43, %c1_44, %c0_45] : memref<4x5x128xbf16, #tpu.memory_space<vmem>>, vector<4x4x128xbf16>
    tpu.vector_store %arg12[%c0_43, %c1_44, %c0_45], %37 {strides = array<i32>} : memref<4x5x128xbf16, #tpu.memory_space<vmem>>, vector<4x4x128xbf16>,
    %c0_46 = arith.constant 0 : index
    %c2 = arith.constant 2 : index
    %c0_47 = arith.constant 0 : index
    %c0_48 = arith.constant 0 : index
    %39 = vector.load %arg1[%c0_46, %c2, %c0_47, %c0_48] : memref<1x4x16x32xbf16, #tpu.memory_space<vmem>>, vector<1x1x16x32xbf16>
    %40 = vector.shape_cast %39 : vector<1x1x16x32xbf16> to vector<16x32xbf16>
    %cst_49 = arith.constant dense<0.000000e+00> : vector<16x128xf32>
    %41 = tpu.matmul %40, %0, %cst_49 {dimension_numbers = #tpu.dot_dimension_numbers<[1], [0], [0], [1], [0, 0, 1, 1], [], []>} : vector<16x32xbf16>, vector<32x128xbf16>, vector<16x128xf32> -> vector<16x128xf32>
    %42 = vector.broadcast %3 : vector<1x128xf32> to vector<16x128xf32>
    %43 = arith.mulf %41, %42 : vector<16x128xf32>
    %44 = vector.broadcast %4 : vector<1x128xf32> to vector<16x128xf32>
    %45 = arith.addf %43, %44 : vector<16x128xf32>
    %cst_50 = arith.constant 0.000000e+00 : f32
    %46 = vector.broadcast %cst_50 : f32 to vector<16x128xf32>
    %47 = arith.maximumf %45, %46 : vector<16x128xf32>
    %48 = arith.truncf %47 : vector<16x128xf32> to vector<16x128xbf16>
    %49 = vector.shape_cast %48 : vector<16x128xbf16> to vector<4x4x128xbf16>
    %c1_51 = arith.constant 1 : index
    %c0_52 = arith.constant 0 : index
    %c0_53 = arith.constant 0 : index
    %50 = vector.load %arg13[%c1_51, %c0_52, %c0_53] : memref<5x4x128xbf16, #tpu.memory_space<vmem>>, vector<4x4x128xbf16>
    tpu.vector_store %arg13[%c1_51, %c0_52, %c0_53], %49 {strides = array<i32>} : memref<5x4x128xbf16, #tpu.memory_space<vmem>>, vector<4x4x128xbf16>,
    %c0_54 = arith.constant 0 : index
    %c3 = arith.constant 3 : index
    %c0_55 = arith.constant 0 : index
    %c0_56 = arith.constant 0 : index
    %51 = vector.load %arg1[%c0_54, %c3, %c0_55, %c0_56] : memref<1x4x16x32xbf16, #tpu.memory_space<vmem>>, vector<1x1x16x32xbf16>
    %52 = vector.shape_cast %51 : vector<1x1x16x32xbf16> to vector<16x32xbf16>
    %cst_57 = arith.constant dense<0.000000e+00> : vector<16x128xf32>
    %53 = tpu.matmul %52, %0, %cst_57 {dimension_numbers = #tpu.dot_dimension_numbers<[1], [0], [0], [1], [0, 0, 1, 1], [], []>} : vector<16x32xbf16>, vector<32x128xbf16>, vector<16x128xf32> -> vector<16x128xf32>
    %54 = vector.broadcast %3 : vector<1x128xf32> to vector<16x128xf32>
    %55 = arith.mulf %53, %54 : vector<16x128xf32>
    %56 = vector.broadcast %4 : vector<1x128xf32> to vector<16x128xf32>
    %57 = arith.addf %55, %56 : vector<16x128xf32>
    %cst_58 = arith.constant 0.000000e+00 : f32
    %58 = vector.broadcast %cst_58 : f32 to vector<16x128xf32>
    %59 = arith.maximumf %57, %58 : vector<16x128xf32>
    %60 = arith.truncf %59 : vector<16x128xf32> to vector<16x128xbf16>
    %61 = vector.shape_cast %60 : vector<16x128xbf16> to vector<4x4x128xbf16>
    %c1_59 = arith.constant 1 : index
    %c1_60 = arith.constant 1 : index
    %c0_61 = arith.constant 0 : index
    %62 = vector.load %arg14[%c1_59, %c1_60, %c0_61] : memref<5x5x128xbf16, #tpu.memory_space<vmem>>, vector<4x4x128xbf16>
    tpu.vector_store %arg14[%c1_59, %c1_60, %c0_61], %61 {strides = array<i32>} : memref<5x5x128xbf16, #tpu.memory_space<vmem>>, vector<4x4x128xbf16>,
    %c0_62 = arith.constant 0 : index
    %c0_63 = arith.constant 0 : index
    %c0_64 = arith.constant 0 : index
    %63 = vector.load %arg14[%c0_62, %c0_63, %c0_64] : memref<5x5x128xbf16, #tpu.memory_space<vmem>>, vector<4x4x128xbf16>
    %c0_65 = arith.constant 0 : index
    %c0_66 = arith.constant 0 : index
    %c0_67 = arith.constant 0 : index
    %64 = vector.load %arg13[%c0_65, %c0_66, %c0_67] : memref<5x4x128xbf16, #tpu.memory_space<vmem>>, vector<4x4x128xbf16>
    %c0_68 = arith.constant 0 : index
    %c1_69 = arith.constant 1 : index
    %c0_70 = arith.constant 0 : index
    %65 = vector.load %arg14[%c0_68, %c1_69, %c0_70] : memref<5x5x128xbf16, #tpu.memory_space<vmem>>, vector<4x4x128xbf16>
    %c0_71 = arith.constant 0 : index
    %c0_72 = arith.constant 0 : index
    %c0_73 = arith.constant 0 : index
    %66 = vector.load %arg12[%c0_71, %c0_72, %c0_73] : memref<4x5x128xbf16, #tpu.memory_space<vmem>>, vector<4x4x128xbf16>
    %c0_74 = arith.constant 0 : index
    %c0_75 = arith.constant 0 : index
    %c0_76 = arith.constant 0 : index
    %67 = vector.load %arg11[%c0_74, %c0_75, %c0_76] : memref<4x4x128xbf16, #tpu.memory_space<vmem>>, vector<4x4x128xbf16>
    %c0_77 = arith.constant 0 : index
    %c1_78 = arith.constant 1 : index
    %c0_79 = arith.constant 0 : index
    %68 = vector.load %arg12[%c0_77, %c1_78, %c0_79] : memref<4x5x128xbf16, #tpu.memory_space<vmem>>, vector<4x4x128xbf16>
    %c1_80 = arith.constant 1 : index
    %c0_81 = arith.constant 0 : index
    %c0_82 = arith.constant 0 : index
    %69 = vector.load %arg14[%c1_80, %c0_81, %c0_82] : memref<5x5x128xbf16, #tpu.memory_space<vmem>>, vector<4x4x128xbf16>
    %c1_83 = arith.constant 1 : index
    %c0_84 = arith.constant 0 : index
    %c0_85 = arith.constant 0 : index
    %70 = vector.load %arg13[%c1_83, %c0_84, %c0_85] : memref<5x4x128xbf16, #tpu.memory_space<vmem>>, vector<4x4x128xbf16>
    %c1_86 = arith.constant 1 : index
    %c1_87 = arith.constant 1 : index
    %c0_88 = arith.constant 0 : index
    %71 = vector.load %arg14[%c1_86, %c1_87, %c0_88] : memref<5x5x128xbf16, #tpu.memory_space<vmem>>, vector<4x4x128xbf16>
    %72 = tpu.concatenate %63, %64, %65, %66, %67, %68, %69, %70, %71 in 2 : vector<4x4x128xbf16>, vector<4x4x128xbf16>, vector<4x4x128xbf16>, vector<4x4x128xbf16>, vector<4x4x128xbf16>, vector<4x4x128xbf16>, vector<4x4x128xbf16>, vector<4x4x128xbf16>, vector<4x4x128xbf16> -> vector<4x4x1152xbf16>
    %73 = vector.shape_cast %72 : vector<4x4x1152xbf16> to vector<16x1152xbf16>
    %cst_89 = arith.constant dense<0.000000e+00> : vector<16x128xf32>
    %74 = tpu.matmul %73, %1, %cst_89 {dimension_numbers = #tpu.dot_dimension_numbers<[1], [0], [0], [1], [0, 0, 1, 1], [], []>} : vector<16x1152xbf16>, vector<1152x128xbf16>, vector<16x128xf32> -> vector<16x128xf32>
    %75 = vector.broadcast %5 : vector<1x128xf32> to vector<16x128xf32>
    %76 = arith.mulf %74, %75 : vector<16x128xf32>
    %77 = vector.broadcast %6 : vector<1x128xf32> to vector<16x128xf32>
    %78 = arith.addf %76, %77 : vector<16x128xf32>
    %cst_90 = arith.constant 0.000000e+00 : f32
    %79 = vector.broadcast %cst_90 : f32 to vector<16x128xf32>
    %80 = arith.maximumf %78, %79 : vector<16x128xf32>
    %81 = arith.truncf %80 : vector<16x128xf32> to vector<16x128xbf16>
    %cst_91 = arith.constant dense<0.000000e+00> : vector<16x32xf32>
    %82 = tpu.matmul %81, %2, %cst_91 {dimension_numbers = #tpu.dot_dimension_numbers<[1], [0], [0], [1], [0, 0, 1, 1], [], []>} : vector<16x128xbf16>, vector<128x32xbf16>, vector<16x32xf32> -> vector<16x32xf32>
    %83 = vector.broadcast %7 : vector<1x32xf32> to vector<16x32xf32>
    %84 = arith.addf %82, %83 : vector<16x32xf32>
    %85 = vector.shape_cast %84 : vector<16x32xf32> to vector<4x4x32xf32>
    %c0_92 = arith.constant 0 : index
    %c0_93 = arith.constant 0 : index
    %c0_94 = arith.constant 0 : index
    %c0_95 = arith.constant 0 : index
    %86 = vector.load %arg10[%c0_92, %c0_93, %c0_94, %c0_95] : memref<1x4x4x32xf32, #tpu.memory_space<vmem>>, vector<1x4x4x32xf32>
    %87 = vector.shape_cast %86 : vector<1x4x4x32xf32> to vector<4x4x32xf32>
    %88 = vector.shape_cast %85 : vector<4x4x32xf32> to vector<1x4x4x32xf32>
    tpu.vector_store %arg10[%c0_92, %c0_93, %c0_94, %c0_95], %88 {strides = array<i32>} : memref<1x4x4x32xf32, #tpu.memory_space<vmem>>, vector<1x4x4x32xf32>,
    return
  }
  func.func @transform_0(%arg0: i32) -> (i32, i32, i32, i32) {
    %c0_i32 = arith.constant 0 : i32
    %c0_i32_0 = arith.constant 0 : i32
    %c0_i32_1 = arith.constant 0 : i32
    %c0_i32_2 = arith.constant 0 : i32
    return %arg0, %c0_i32, %c0_i32_0, %c0_i32_1 : i32, i32, i32, i32
  }
  func.func @transform_1(%arg0: i32) -> (i32, i32) {
    %c0_i32 = arith.constant 0 : i32
    %c0_i32_0 = arith.constant 0 : i32
    %c0_i32_1 = arith.constant 0 : i32
    return %c0_i32, %c0_i32_0 : i32, i32
  }
  func.func @transform_2(%arg0: i32) -> (i32, i32) {
    %c0_i32 = arith.constant 0 : i32
    %c0_i32_0 = arith.constant 0 : i32
    %c0_i32_1 = arith.constant 0 : i32
    return %c0_i32, %c0_i32_0 : i32, i32
  }
  func.func @transform_3(%arg0: i32) -> (i32, i32) {
    %c0_i32 = arith.constant 0 : i32
    %c0_i32_0 = arith.constant 0 : i32
    %c0_i32_1 = arith.constant 0 : i32
    return %c0_i32, %c0_i32_0 : i32, i32
  }
  func.func @transform_4(%arg0: i32) -> (i32, i32) {
    %c0_i32 = arith.constant 0 : i32
    %c0_i32_0 = arith.constant 0 : i32
    %c0_i32_1 = arith.constant 0 : i32
    return %c0_i32, %c0_i32_0 : i32, i32
  }
  func.func @transform_5(%arg0: i32) -> (i32, i32) {
    %c0_i32 = arith.constant 0 : i32
    %c0_i32_0 = arith.constant 0 : i32
    %c0_i32_1 = arith.constant 0 : i32
    return %c0_i32, %c0_i32_0 : i32, i32
  }
  func.func @transform_6(%arg0: i32) -> (i32, i32) {
    %c0_i32 = arith.constant 0 : i32
    %c0_i32_0 = arith.constant 0 : i32
    %c0_i32_1 = arith.constant 0 : i32
    return %c0_i32, %c0_i32_0 : i32, i32
  }
  func.func @transform_7(%arg0: i32) -> (i32, i32) {
    %c0_i32 = arith.constant 0 : i32
    %c0_i32_0 = arith.constant 0 : i32
    %c0_i32_1 = arith.constant 0 : i32
    return %c0_i32, %c0_i32_0 : i32, i32
  }
  func.func @transform_8(%arg0: i32) -> (i32, i32) {
    %c0_i32 = arith.constant 0 : i32
    %c0_i32_0 = arith.constant 0 : i32
    %c0_i32_1 = arith.constant 0 : i32
    return %c0_i32, %c0_i32_0 : i32, i32
  }
  func.func @transform_9(%arg0: i32) -> (i32, i32, i32, i32) {
    %c0_i32 = arith.constant 0 : i32
    %c0_i32_0 = arith.constant 0 : i32
    %c0_i32_1 = arith.constant 0 : i32
    %c0_i32_2 = arith.constant 0 : i32
    return %arg0, %c0_i32, %c0_i32_0, %c0_i32_1 : i32, i32, i32, i32
  }
}

</mosaic_0001>

<bundles_post_ra>
// kernel: conv_stem_forward.1
= control target key start
LH: loop header
LB: loop body
LE: loop exit
PB: predicated region body
PF: predicated region fallthrough
CT: control target
= control target key end

     0   :  { %14 = vsyncpa [#allocation7], 0  ;;  %s3459_s0 = inlined_call_operand.vmem [shape: bf16[2,4,16,32], index: 0, kind: input, shape index: {}]   ;;  %s3460_s1 = inlined_call_operand.vmem [shape: bf16[32,128], index: 1, kind: input, shape index: {}]   ;;  %s3461_s2 = inlined_call_operand.vmem [shape: f32[1,128], index: 2, kind: input, shape index: {}]   ;;  %s3462_s3 = inlined_call_operand.vmem [shape: f32[1,128], index: 3, kind: input, shape index: {}]   ;;  %s3463_s4 = inlined_call_operand.vmem [shape: bf16[1152,128], index: 4, kind: input, shape index: {}]   ;;  %s3464_s5 = inlined_call_operand.vmem [shape: f32[1,128], index: 5, kind: input, shape index: {}]   ;;  %s3465_s6 = inlined_call_operand.vmem [shape: f32[1,128], index: 6, kind: input, shape index: {}]   ;;  %s3466_s7 = inlined_call_operand.vmem [shape: bf16[128,32], index: 7, kind: input, shape index: {}]   ;;  %s3467_s8 = inlined_call_operand.vmem [shape: f32[1,32], index: 8, kind: input, shape index: {}]   ;;  %s3468_s9 = inlined_call_operand.hbm [shape: f32[2,4,4,32], index: 9, kind: output, shape index: {}]  }
   0x1   :  { %16 = vsyncpa [#allocation7 + $0x1], 0  ;;  %s2908_s30 = smov 0   ;;  %s2910_s10 = smov 0  }
   0x2   :  { %s2912_s11 = smov 0   ;;  %s2914_s12 = smov 0  }
   0x3 LB: > { %s2929_s13 = sadd.s32 4294967295, %s2849_s12   ;;  %s2311_s14 = sadd.s32 4294967294, %s2849_s12   ;;  %s2849_s12 = sphi %s2914_s12, %s3478_s12   ;;  %s2845_s11 = sphi %s2912_s11, %s3477_s11   ;;  %s2841_s10 = sphi %s2910_s10, %s3476_s10   ;;  %s2837_s30 = sphi %s2908_s30, %s3475_s30  }
   0x4   : > { %s2933_s15 = sadd.s32 1, %s2849_s12   ;;  %s223_s16 = sadd.s32 1, %s2845_s11 }
   0x5   : > { %s220_s17 = ssub.s32 %s2849_s12, %s2933_s15  ;;  %p233_p0 = scmp.ne.s32.totalorder %s2845_s11, %s2841_s10 }
   0x6   : > { %p221_p1 = scmp.eq.s32.totalorder %s220_s17, 0  ;;  %p234_p2 = scmp.eq.s32.totalorder %s2929_s13, 1 }
   0x7   : > { %p239_p3 = scmp.ne.s32.totalorder %s2841_s10, %s2837_s30  ;;  %p240_p4 = scmp.eq.s32.totalorder %s2311_s14, 1 }
   0x8   : > { %s2944_s18 = scalar_select %p221_p1, %s2845_s11, %s223_s16  }
   0x9   : > { %p2946_p5 = por %p234_p2, %p233_p0  ;;  %p2950_p6 = por %p240_p4, %p239_p3 }
   0xa   : > { %p2314_p7 = scmp.ge.s32.totalorder %s2849_s12, 1  ;;  %p290_p8 = scmp.lt.s32.totalorder %s2849_s12, 3 }
   0xc   : > { %p291_p9 = pnand %p2314_p7, %p290_p8 }
   0xd   : > { %v2689_v0 = vld [vmem:[%s3460_s1] sm:$0xff] (!%p291_p9)   ;;  %v2851_v1 = vmov (!%p291_p9), 0.0   ;;  %v2690_v2 = vld [vmem:[%s3460_s1 + $0x8] sm:$0xff] (!%p291_p9)   ;;  %vm2852_vm0 = vmmov (!%p291_p9), 0   ;;  %p326_p10 = scmp.lt.s32.totalorder (!%p291_p9), %s2929_s13, 1  ;;  %vm555_vm1 = vcmask (!%p291_p9), 261120  }
   0xe   : > { %294 = sbr.rel (%p291_p9) target bundleno = 811 (0x32b), region = 56  ;;  %2580 = vmatprep.subr.bf16.mxu1 (!%p291_p9), %v2851_v1  ;;  %2572 = vmatprep.subr.bf16.mxu0 (!%p291_p9), %v2851_v1  ;;  %vm501_vm2 = vcmask (!%p291_p9), 1040384   ;;  %vm502_vm3 = vsmask.f32 (!%p291_p9), 256  ;;  %v504_v7 = vld [vmem:[#allocation3] sm:$0x1] (!%p291_p9) }
   0xf   : > { %2581 = vmatpush3.bf16.msra.mxu1 (!%p291_p9), %v2689_v0  ;;  %2584 = vmatprep.mubr.msk.bf16.mxu1 (!%p291_p9), %vm2852_vm0, %v2851_v1  ;;  %vm530_vm4 = vcmask (!%p291_p9), 1042432   ;;  %vm2987_vm5 = vmand (!%p291_p9), %vm501_vm2, %vm502_vm3  ;;  %v507_v9 = vld [vmem:[#allocation3 + $0x4] sm:$0x1] (!%p291_p9)  ;;  %v510_v10 = vld [vmem:[#allocation3 + $0x8] sm:$0x1] (!%p291_p9)  ;;  %v2853_v39 = vmov (!%p291_p9), 0  }
  0x10   : > { %2582 = vmatprep.subr.bf16.mxu1 (!%p291_p9), %v2851_v1  ;;  %2573 = vmatpush3.bf16.msra.mxu0 (!%p291_p9), %v2689_v0  ;;  %vm531_vm6 = vsmask.f32 (!%p291_p9), 2304  ;;  %v505_v11 = vsel (!%p291_p9), %vm2987_vm5, 0, %v504_v7  ;;  %v508_v12 = vsel (!%p291_p9), %vm2987_vm5, 0, %v507_v9  ;;  %v511_v13 = vsel (!%p291_p9), %vm2987_vm5, 0, %v510_v10  ;;  %v2695_v18 = vld [vmem:[%s3463_s4 + $0x40] sm:$0xff] (!%p291_p9)  }
  0x11   : > { %2574 = vmatprep.subr.bf16.mxu0 (!%p291_p9), %v2851_v1  ;;  %2576 = vmatprep.mubr.msk.bf16.mxu0 (!%p291_p9), %vm2852_vm0, %v2851_v1  ;;  %v513_v14 = vld [vmem:[#allocation3 + $0xc] sm:$0x1] (!%p291_p9)  ;;  %vm532_vm7 = vmand (!%p291_p9), %vm530_vm4, %vm531_vm6  ;;  %506 = vst [vmem:[#allocation3] sm:$0x1] (!%p291_p9), %v505_v11  ;;  %v533_v16 = vld [vmem:[#allocation5] sm:$0x7] (!%p291_p9) }
  0x12   : > { %509 = vst [vmem:[#allocation3 + $0x4] sm:$0x1] (!%p291_p9), %v508_v12  ;;  %512 = vst [vmem:[#allocation3 + $0x8] sm:$0x1] (!%p291_p9), %v511_v13  ;;  %v514_v15 = vsel (!%p291_p9), %vm2987_vm5, 0, %v513_v14  ;;  %v534_v17 = vsel (!%p291_p9), %vm532_vm7, 0, %v533_v16 }
  0x13   : > { %2583 = vmatpush3.bf16.msra.mxu1 (!%p291_p9), %v2690_v2  ;;  %515 = vst [vmem:[#allocation3 + $0xc] sm:$0x1] (!%p291_p9), %v514_v15  ;;  %535 = vst [vmem:[#allocation5] sm:$0x7] (!%p291_p9), %v534_v17  ;;  %v517_v19 = vld [vmem:[#allocation5 + $0x4] sm:$0x1] (!%p291_p9) }
  0x14   : > { %2596 = vmatprep.subr.bf16.mxu1 (!%p291_p9), %v2851_v1  ;;  %2575 = vmatpush3.bf16.msra.mxu0 (!%p291_p9), %v2690_v2  ;;  %v523_v20 = vld [vmem:[#allocation5 + $0xc] sm:$0x1] (!%p291_p9)  ;;  %v518_v21 = vsel (!%p291_p9), %vm2987_vm5, 0, %v517_v19  ;;  %v520_v23 = vld [vmem:[#allocation5 + $0x8] sm:$0x1] (!%p291_p9)  ;;  %v2696_v27 = vld [vmem:[%s3463_s4] sm:$0xff] (!%p291_p9)  }
  0x15   : > { %s327_s25 = scalar_select %p326_p10, %s2929_s13, 1  ;;  %2588 = vmatprep.subr.bf16.mxu0 %v2851_v1  ;;  %v524_v22 = vsel %vm2987_vm5, 0, %v523_v20  ;;  %519 = vst [vmem:[#allocation5 + $0x4] sm:$0x1] %v518_v21  ;;  %v526_v24 = vld [vmem:[#allocation5 + $0x10] sm:$0x1] }
  0x16   : > { %525 = vst [vmem:[#allocation5 + $0xc] sm:$0x1] %v524_v22  ;;  %v521_v25 = vsel %vm2987_vm5, 0, %v520_v23  ;;  %v527_v26 = vsel %vm2987_vm5, 0, %v526_v24  ;;  %v2697_v28 = vld [vmem:[%s3463_s4 + $0x48] sm:$0xff]   ;;  %v2700_v30 = vld [vmem:[%s3463_s4 + $0xc0] sm:$0xff]  }
  0x17   : > { %s2452_s26 = sshll.u32 %s327_s25, 5  ;;  %522 = vst [vmem:[#allocation5 + $0x8] sm:$0x1] %v521_v25  ;;  %528 = vst [vmem:[#allocation5 + $0x10] sm:$0x1] %v527_v26  ;;  %v2698_v29 = vld [vmem:[%s3463_s4 + $0x8] sm:$0xff]  }
  0x18   : > { %s330_s29 = scalar_lea.vmem %s3459_s0, %s2452_s26  ;;  %v2699_v31 = vld [vmem:[%s3463_s4 + $0x50] sm:$0xff]   ;;  %v2702_v32 = vld [vmem:[%s3463_s4 + $0x80] sm:$0xff]   ;;  %v2704_v34 = vld [vmem:[%s3463_s4 + $0xc8] sm:$0xff]   ;;  %529 = vst [vmem:[#allocation4] sm:$0x3] %v2853_v39  ;;  %s323_s14 = sand.u32 1, %s2841_s10  }
  0x19   : > { %v2691_v3 = vld [vmem:[%s330_s29 + $0x8] sm:$0xff]   ;;  %v2692_v4 = vld [vmem:[%s330_s29] sm:$0xff]   ;;  %v2693_v5 = vld [vmem:[%s330_s29 + $0x18] sm:$0xff]   ;;  %v2854_v62 = vmov 1983009808   ;;  %s2315_s16 = sshll.u32 %s323_s14, 4 }
  0x1a   : > { %2585 = vmatmul.mubr.msk.bf16.vlgmr.msra.gmra.mrb[0].mxu1 %vm555_vm1, %v2691_v3  ;;  %2577 = vmatmul.mubr.msk.bf16.vlgmr.msra.gmra.mrb[0].mxu0 %vm555_vm1, %v2692_v4  ;;  %v2694_v6 = vld [vmem:[%s330_s29 + $0x10] sm:$0xff]   ;;  %v2703_v35 = vld [vmem:[%s3463_s4 + $0x58] sm:$0xff]   ;;  %v2706_v36 = vld [vmem:[%s3463_s4 + $0x88] sm:$0xff]   ;;  %v622_v63 = vunpack.c.l.s4 %v2854_v62  ;;  %vm782_vm8 = vsmask.f32 2306  ;;  %vm2230_vm10 = vcmask 257024  }
  0x1b   : > { %2597 = vmatpush3.bf16.msra.mxu1 %v2689_v0  ;;  %2600 = vmatprep.mubr.msk.bf16.mxu1 %vm2852_vm0, %v2851_v1  ;;  %v2701_v33 = vld [vmem:[%s3463_s4 + $0x10] sm:$0xff]   ;;  %v2705_v37 = vld [vmem:[%s3463_s4 + $0x18] sm:$0xff]   ;;  %v2707_v40 = vld [vmem:[%s3463_s4 + $0x60] sm:$0xff]   ;;  %s325_s22 = scalar_lea.vmem [#allocation6], %s2315_s16  ;;  %s2453_s24 = sshll.u32 %s2929_s13, 8 }
  0x1c   : > { %2598 = vmatprep.subr.bf16.mxu1 %v2851_v1  ;;  %2589 = vmatpush3.bf16.msra.mxu0 %v2689_v0  ;;  %v2708_v38 = vld [vmem:[%s3463_s4 + $0xd0] sm:$0xff]   ;;  %v2712_v42 = vld [vmem:[%s3463_s4 + $0xd8] sm:$0xff]   ;;  %v2709_v43 = vld [vmem:[%s3463_s4 + $0x20] sm:$0xff]   ;;  %v624_v0 = vlaneseq  ;;  %v623_v11 = vunpack.c.0.s8 %v622_v63  ;;  %s2249_s23 = sshll.u32 %s325_s22, 4  ;;  %s3415_s27 = scalar_lea.hbm %s3468_s9, %s2453_s24  ;;  %s3408_s23 = int_to_ptr.vmem [resolvable:$true] %s2249_s23 }
  0x1d   : > { %2592 = vmatprep.mubr.msk.bf16.mxu0 %vm2852_vm0, %v2851_v1  ;;  %2590 = vmatprep.subr.bf16.mxu0 %v2851_v1  ;;  %v2710_v41 = vld [vmem:[%s3463_s4 + $0x90] sm:$0xff]   ;;  %v2714_v44 = vld [vmem:[%s3463_s4 + $0x98] sm:$0xff]   ;;  %v2711_v45 = vld [vmem:[%s3463_s4 + $0x68] sm:$0xff]   ;;  %s3418_s13 = scalar_lea.sflag [#allocation7], %s323_s14  ;;  %s2787_s28 = scalar_lea.vmem %s3408_s23, 256 }
  0x1e   : > { %v2716_v46 = vld [vmem:[%s3463_s4 + $0xe0] sm:$0xff]   ;;  %v2713_v47 = vld [vmem:[%s3463_s4 + $0x28] sm:$0xff]   ;;  %v2715_v49 = vld [vmem:[%s3463_s4 + $0x70] sm:$0xff]   ;;  %v625_v12 = vshrl.u32 %v624_v0, 7  ;;  %p2788_p11 = scmp.ne.s32.totalorder %s3408_s23, %s2787_s28  ;;  %s2855_s29 = smov [#allocation6]  }
  0x1f   : > { %2599 = vmatpush3.bf16.msra.mxu1 %v2690_v2  ;;  %v2718_v48 = vld [vmem:[%s3463_s4 + $0xa0] sm:$0xff]   ;;  %v2720_v50 = vld [vmem:[%s3463_s4 + $0xe8] sm:$0xff]   ;;  %v2717_v51 = vld [vmem:[%s3463_s4 + $0x30] sm:$0xff]   ;;  %s2791_s16 = sshll.u32 %s2855_s29, 4  ;;  %s2792_s16 = int_to_ptr.vmem [resolvable:$false] %s2791_s16 }
  0x20   : > { %2591 = vmatpush3.bf16.msra.mxu0 %v2690_v2  ;;  %2488 = vmatprep.subr.bf16.mxu1 %v2700_v30  ;;  %v2722_v52 = vld [vmem:[%s3463_s4 + $0xa8] sm:$0xff]   ;;  %v2719_v53 = vld [vmem:[%s3463_s4 + $0x78] sm:$0xff]   ;;  %v2723_v55 = vld [vmem:[%s3463_s4 + $0xf0] sm:$0xff]   ;;  %v3128_v23 = vsub.s32 %v623_v11, %v625_v12  ;;  %p2789_p12 = pnand %p2788_p11, %p2946_p5  ;;  %s2793_s17 = scalar_lea.vmem %s2792_s16, 512 }
  0x21   : > { %2466 = vmatprep.subr.bf16.mxu0 %v2695_v18  ;;  %v2721_v54 = vld [vmem:[%s3463_s4 + $0x38] sm:$0xff]   ;;  %v2724_v56 = vld [vmem:[%s3463_s4 + $0x140] sm:$0xff]   ;;  %v2725_v57 = vld [vmem:[%s3463_s4 + $0xb0] sm:$0xff]   ;;  %p2794_p0 = scmp.lt.s32.totalorder %s3408_s23, %s2792_s16  ;;  %p2795_p1 = scmp.lt.s32.totalorder %s2793_s17, %s2787_s28 }
  0x22   : > { %2601 = vmatmul.mubr.msk.bf16.vlgmr.msra.gmra.mrb[4].mxu1 %vm555_vm1, %v2693_v5  ;;  %v2731_v58 = vld [vmem:[%s3463_s4 + $0xf8] sm:$0xff]   ;;  %v2740_v60 = vld [vmem:[%s3463_s4 + $0x1c0] sm:$0xff]   ;;  %vm3146_vm9 = vmand %vm530_vm4, %vm782_vm8  ;;  %p2790_p13 = pneg %p2789_p12 }
  0x23   : > { %2593 = vmatmul.mubr.msk.bf16.vlgmr.msra.gmra.mrb[4].mxu0 %vm555_vm1, %v2694_v6  ;;  %2489 = vmatpush3.bf16.msra.mxu1 %v2702_v32  ;;  %v2733_v59 = vld [vmem:[%s3463_s4 + $0xb8] sm:$0xff]   ;;  %v3113_v61 = vld [vmem:[%s3461_s2] ss:$0 sm:$0xff]  ;;  %p2796_p2 = por %p2795_p1, %p2794_p0 }
  0x24   : > { %2467 = vmatpush3.bf16.msra.mxu0 %v2696_v27  ;;  %2490 = vmatprep.subr.bf16.mxu1 %v2704_v34  ;;  %v3118_v2 = vld [vmem:[%s3462_s3] ss:$0 sm:$0xff] }
  0x25   : > { %2468 = vmatprep.subr.bf16.mxu0 %v2697_v28  ;;  %p2797_p3 = pnand %p2796_p2, %p2790_p13 }
  0x27   : > { %2491 = vmatpush3.bf16.msra.mxu1 %v2706_v36 }
  0x28   : > { %2469 = vmatpush3.bf16.msra.mxu0 %v2698_v29  ;;  %2492 = vmatprep.subr.bf16.mxu1 %v2708_v38 }
  0x29   : > { %2470 = vmatprep.subr.bf16.mxu0 %v2699_v31 }
  0x2b   : > { %2493 = vmatpush3.bf16.msra.mxu1 %v2710_v41 }
  0x2c   : > { %2471 = vmatpush3.bf16.msra.mxu0 %v2701_v33  ;;  %2494 = vmatprep.subr.bf16.mxu1 %v2712_v42 }
  0x2d   : > { %2472 = vmatprep.subr.bf16.mxu0 %v2703_v35 }
  0x2f   : > { %2495 = vmatpush3.bf16.msra.mxu1 %v2714_v44 }
  0x30   : > { %2473 = vmatpush3.bf16.msra.mxu0 %v2705_v37  ;;  %2496 = vmatprep.subr.bf16.mxu1 %v2716_v46 }
  0x31   : > { %2474 = vmatprep.subr.bf16.mxu0 %v2707_v40 }
  0x33   : > { %2497 = vmatpush3.bf16.msra.mxu1 %v2718_v48 }
  0x34   : > { %2475 = vmatpush3.bf16.msra.mxu0 %v2709_v43  ;;  %2498 = vmatprep.subr.bf16.mxu1 %v2720_v50 }
  0x35   : > { %2476 = vmatprep.subr.bf16.mxu0 %v2711_v45 }
  0x37   : > { %2499 = vmatpush3.bf16.msra.mxu1 %v2722_v52 }
  0x38   : > { %2477 = vmatpush3.bf16.msra.mxu0 %v2713_v47  ;;  %2500 = vmatprep.subr.bf16.mxu1 %v2723_v55 }
  0x39   : > { %2478 = vmatprep.subr.bf16.mxu0 %v2715_v49 }
  0x3b   : > { %2501 = vmatpush3.bf16.msra.mxu1 %v2725_v57 }
  0x3c   : > { %2479 = vmatpush3.bf16.msra.mxu0 %v2717_v51  ;;  %2502 = vmatprep.subr.bf16.mxu1 %v2731_v58 }
  0x3d   : > { %2480 = vmatprep.subr.bf16.mxu0 %v2719_v53 }
  0x3f   : > { %2503 = vmatpush3.bf16.msra.mxu1 %v2733_v59 }
  0x40   : > { %2481 = vmatpush3.bf16.msra.mxu0 %v2721_v54  ;;  %2532 = vmatprep.subr.bf16.mxu1 %v2740_v60 }
  0x41   : > { %2510 = vmatprep.subr.bf16.mxu0 %v2724_v56 }
  0xed   : > { %v690_v3 = vpop.f32.mrb[0].mxu1  ;;  %v593_v6 = vpop.f32.mrb[0].mxu0 }
  0xee   : > { %v697_v4 = vmul.f32 %v3113_v61, %v690_v3  ;;  %v2586_v5 = vpop.f32.mrb[1].mxu1  ;;  %v606_v8 = vmul.f32 %v3113_v61, %v593_v6  ;;  %v2578_v9 = vpop.f32.mrb[1].mxu0 }
  0xef   : > { %v693_v7 = vpop.f32.mrb[2].mxu1  ;;  %v596_v15 = vpop.f32.mrb[2].mxu0 }
  0xf0   : > { %v699_v10 = vadd.f32 %v3118_v2, %v697_v4  ;;  %v698_v13 = vmul.f32 %v3113_v61, %v693_v7  ;;  %v2587_v14 = vpop.f32.mrb[3].mxu1  ;;  %v614_v16 = vadd.f32 %v3118_v2, %v606_v8  ;;  %v607_v17 = vmul.f32 %v3113_v61, %v596_v15  ;;  %v2579_v18 = vpop.f32.mrb[3].mxu0  ;;  %v784_v7 = vld [vmem:[#allocation3] sm:$0x7] }
  0xf1   : > { %v790_v14 = vld [vmem:[#allocation3 + $0x8] sm:$0x7] }
  0xf2   : > { %v700_v19 = vadd.f32 %v3118_v2, %v698_v13  ;;  %v616_v20 = vmax.f32 %v614_v16, 0.0  ;;  %v615_v21 = vadd.f32 %v3118_v2, %v607_v17  ;;  %v701_v22 = vmax.f32 %v699_v10, 0.0  ;;  %v787_v16 = vld [vmem:[#allocation3 + $0x4] sm:$0x7]  ;;  %v793_v17 = vld [vmem:[#allocation3 + $0xc] sm:$0x7] }
  0xf4   : > { %v702_v24 = vmax.f32 %v700_v19, 0.0  ;;  %v617_v26 = vmax.f32 %v615_v21, 0.0 }
  0xf5   : > { %v927_v25 = vpop.f32.mrb[4].mxu1 }
  0xf6   : > { %v703_v27 = vpack.c.bf16 %v702_v24, %v701_v22  ;;  %v2331_v28 = vpack.c.bf16 %v702_v24, %v702_v24  ;;  %v934_v29 = vmul.f32 %v3113_v61, %v927_v25  ;;  %v2602_v30 = vpop.f32.mrb[5].mxu1  ;;  %v618_v31 = vpack.c.bf16 %v617_v26, %v616_v20  ;;  %v841_v34 = vpop.f32.mrb[4].mxu0 }
  0xf7   : > { %v2324_v32 = vpack.c.bf16 %v617_v26, %v617_v26  ;;  %v930_v33 = vpop.f32.mrb[6].mxu1  ;;  %v2594_v40 = vpop.f32.mrb[5].mxu0  ;;  %v848_v43 = vmul.f32 %v3113_v61, %v841_v34 }
  0xf8   : > { %v712_v35 = vrot.slane %v703_v27, %v3128_v23  ;;  %v719_v36 = vrot.slane %v2331_v28, %v3128_v23  ;;  %v936_v37 = vadd.f32 %v3118_v2, %v934_v29  ;;  %v935_v38 = vmul.f32 %v3113_v61, %v930_v33  ;;  %v2603_v39 = vpop.f32.mrb[7].mxu1  ;;  %2325 = vst.sshfl [vmem:[#allocation2] sm:$0x3 pattern:$0x76325410] %v618_v31  ;;  %v844_v44 = vpop.f32.mrb[6].mxu0 }
  0xf9   : > { %v627_v41 = vrot.slane %v618_v31, %v3128_v23  ;;  %v634_v42 = vrot.slane %v2324_v32, %v3128_v23  ;;  %2326 = vst.sshfl [vmem:[#allocation2 + $0x4] sm:$0x3 pattern:$0x76325410] %v2324_v32  ;;  %v2595_v49 = vpop.f32.mrb[7].mxu0  ;;  %v850_v3 = vadd.f32 %v3118_v2, %v848_v43  ;;  %v849_v20 = vmul.f32 %v3113_v61, %v844_v44 }
  0xfa   : > { %v720_v45 = vcombine.high %v712_v35, %v712_v35  ;;  %v721_v46 = vcombine.high %v719_v36, %v719_v36  ;;  %v728_v47 = vrot.slane %v712_v35, %v3128_v23  ;;  %v742_v48 = vrot.slane %v719_v36, %v3128_v23  ;;  %v3166_v39 = vld [vmem:[#allocation5] ss:$0 sps:$4 sm:$0x77]   ;;  %v1019_v44 = vld [vmem:[#allocation5 + $0x4] sm:$0x7] }
  0xfb   : > { %v635_v50 = vcombine.high %v627_v41, %v627_v41  ;;  %v636_v51 = vcombine.high %v634_v42, %v634_v42  ;;  %v937_v52 = vadd.f32 %v3118_v2, %v935_v38  ;;  %v938_v56 = vmax.f32 %v936_v37, 0.0 }
  0xfc   : > { %v735_v53 = vrot.slane %v720_v45, %v3128_v23  ;;  %v749_v54 = vrot.slane %v721_v46, %v3128_v23  ;;  %v751_v55 = vshrl.u32 %v728_v47, 16  ;;  %v754_v57 = vshll.u32 %v728_v47, 16  ;;  %v1025_v47 = vld [vmem:[#allocation5 + $0xc] sm:$0x7] }
  0xfd   : > { %v765_v58 = vshrl.u32 %v742_v48, 16  ;;  %v768_v59 = vshll.u32 %v742_v48, 16  ;;  %642 = vst [vmem:[#allocation2 + $0x2] sm:$0x3] %v635_v50  ;;  %644 = vst [vmem:[#allocation2 + $0x6] sm:$0x3] %v636_v51  ;;  %v851_v32 = vadd.f32 %v3118_v2, %v849_v20 }
  0xfe   : > { %v939_v60 = vmax.f32 %v937_v52, 0.0  ;;  %v753_v62 = vrot.slane %v751_v55, 7  ;;  %v758_v63 = vshrl.u32 %v735_v53, 16  ;;  %v772_v0 = vshrl.u32 %v749_v54, 16  ;;  %v1022_v2 = vld [vmem:[#allocation5 + $0x8] sm:$0x7] }
  0xff   : > { %v761_v4 = vshll.u32 %v735_v53, 16  ;;  %v767_v5 = vrot.slane %v765_v58, 7  ;;  %v775_v13 = vshll.u32 %v749_v54, 16  ;;  %v852_v25 = vmax.f32 %v850_v3, 0.0  ;;  %v1028_v54 = vld [vmem:[#allocation5 + $0x10] sm:$0x7] }
 0x100   : > { %v940_v8 = vpack.c.bf16 %v939_v60, %v938_v56  ;;  %v2343_v9 = vpack.c.bf16 %v939_v60, %v939_v60  ;;  %v756_v10 = vor.u32 %v754_v57, %v753_v62  ;;  %v760_v11 = vrot.slane %v758_v63, 7  ;;  %v1031_v58 = vld [vmem:[#allocation5] sm:$0x3]  ;;  %v1047_v6 = vld [vmem:[#allocation2] sm:$0x3] }
 0x101   : > { %v774_v12 = vrot.slane %v772_v0, 7  ;;  %v770_v15 = vor.u32 %v768_v59, %v767_v5  ;;  %v853_v38 = vmax.f32 %v851_v32, 0.0  ;;  %v1082_v60 = vshll.u32 %v3166_v39, 16 }
 0x102   : > { %v949_v18 = vrot.slane %v940_v8, %v3128_v23  ;;  %v956_v19 = vrot.slane %v2343_v9, %v3128_v23  ;;  %v763_v21 = vor.u32 %v761_v4, %v760_v11  ;;  %v785_v24 = vsel %vm3146_vm9, %v756_v10, %v784_v7  ;;  %v1035_v8 = vld [vmem:[#allocation4] sm:$0x3] }
 0x103   : > { %v777_v22 = vor.u32 %v775_v13, %v774_v12  ;;  %786 = vst [vmem:[#allocation3] sm:$0x7] %v785_v24  ;;  %v791_v26 = vsel %vm3146_vm9, %v770_v15, %v790_v14  ;;  %v854_v48 = vpack.c.bf16 %v853_v38, %v852_v25  ;;  %v2336_v49 = vpack.c.bf16 %v853_v38, %v853_v38  ;;  %v1049_v25 = vld [vmem:[#allocation2 + $0x4] sm:$0x3] }
 0x104   : > { %v957_v27 = vcombine.high %v949_v18, %v949_v18  ;;  %v958_v28 = vcombine.high %v956_v19, %v956_v19  ;;  %v965_v29 = vrot.slane %v949_v18, %v3128_v23  ;;  %v788_v30 = vsel %vm3146_vm9, %v763_v21, %v787_v16  ;;  %792 = vst [vmem:[#allocation3 + $0x8] sm:$0x7] %v791_v26  ;;  %v1050_v32 = vld [vmem:[#allocation2 + $0x6] sm:$0x3] }
 0x105   : > { %v794_v61 = vsel %vm3146_vm9, %v777_v22, %v793_v17  ;;  %v979_v31 = vrot.slane %v956_v19, %v3128_v23  ;;  %789 = vst [vmem:[#allocation3 + $0x4] sm:$0x7] %v788_v30  ;;  %v863_v56 = vrot.slane %v854_v48, %v3128_v23  ;;  %v870_v57 = vrot.slane %v2336_v49, %v3128_v23 }
 0x106   : > { %795 = vst [vmem:[#allocation3 + $0xc] sm:$0x7] %v794_v61  ;;  %v972_v33 = vrot.slane %v957_v27, %v3128_v23  ;;  %v986_v34 = vrot.slane %v958_v28, %v3128_v23  ;;  %v988_v35 = vshrl.u32 %v965_v29, 16  ;;  %v991_v36 = vshll.u32 %v965_v29, 16 }
 0x107   : > { %v1002_v37 = vshrl.u32 %v979_v31, 16  ;;  %v1005_v42 = vshll.u32 %v979_v31, 16  ;;  %2337 = vst.sshfl [vmem:[#allocation4 + $0x2] sm:$0x3 pattern:$0x76325410] %v854_v48  ;;  %v871_v5 = vcombine.high %v863_v56, %v863_v56  ;;  %v872_v7 = vcombine.high %v870_v57, %v870_v57 }
 0x108   : > { %v990_v40 = vrot.slane %v988_v35, 7  ;;  %v995_v41 = vshrl.u32 %v972_v33, 16  ;;  %v1009_v43 = vshrl.u32 %v986_v34, 16  ;;  %v998_v45 = vshll.u32 %v972_v33, 16  ;;  %v1048_v31 = vld [vmem:[#allocation2 + $0x2] sm:$0x3] }
 0x109   : > { %v1004_v46 = vrot.slane %v1002_v37, 7  ;;  %v1012_v53 = vshll.u32 %v986_v34, 16  ;;  %2338 = vst.sshfl [vmem:[#allocation4 + $0x6] sm:$0x3 pattern:$0x76325410] %v2336_v49  ;;  %v1211_v17 = vcombine.low %v1031_v58, %v1035_v8 }
 0x10a   : > { %v993_v50 = vor.u32 %v991_v36, %v990_v40  ;;  %v997_v51 = vrot.slane %v995_v41, 7  ;;  %v1011_v52 = vrot.slane %v1009_v43, 7  ;;  %v2727_v59 = vld [vmem:[#allocation3] ss:$0 sps:$4 sm:$0x77]   ;;  %v1080_v15 = vshrl.u32 %v3166_v39, 16 }
 0x10b   : > { %v1007_v55 = vor.u32 %v1005_v42, %v1004_v46  ;;  %v2729_v3 = vld [vmem:[#allocation3 + $0x8] ss:$0 sps:$4 sm:$0x77]   ;;  %879 = vst [vmem:[#allocation4 + $0x4] sm:$0x3] %v871_v5  ;;  %v1122_v13 = vshll.u32 %v2727_v59, 16  ;;  %v1219_v42 = vrot.slane %v1211_v17, %v3128_v23 }
 0x10c   : > { %v1000_v62 = vor.u32 %v998_v45, %v997_v51  ;;  %v1014_v63 = vor.u32 %v1012_v53, %v1011_v52  ;;  %v1020_v0 = vsel %vm3146_vm9, %v993_v50, %v1019_v44  ;;  %v2728_v11 = vld [vmem:[#allocation3 + $0x4] ss:$0 sps:$4 sm:$0x77]   ;;  %881 = vst [vmem:[#allocation4 + $0x8] sm:$0x3] %v872_v7  ;;  %v1136_v14 = vshll.u32 %v2729_v3, 16 }
 0x10d   : > { %1021 = vst [vmem:[#allocation5 + $0x4] sm:$0x7] %v1020_v0  ;;  %v1026_v4 = vsel %vm3146_vm9, %v1007_v55, %v1025_v47  ;;  %v2730_v12 = vld [vmem:[#allocation3 + $0xc] ss:$0 sps:$4 sm:$0x77]   ;;  %v1084_v16 = vrot.slane %v1082_v60, 1 }
 0x10e   : > { %v1023_v9 = vsel %vm3146_vm9, %v1000_v62, %v1022_v2  ;;  %1027 = vst [vmem:[#allocation5 + $0xc] sm:$0x7] %v1026_v4  ;;  %v1029_v10 = vsel %vm3146_vm9, %v1014_v63, %v1028_v54  ;;  %v1129_v18 = vshll.u32 %v2728_v11, 16  ;;  %v1143_v19 = vshll.u32 %v2730_v12, 16  ;;  %v1036_v30 = vld [vmem:[#allocation4 + $0x2] sm:$0x3] }
 0x10f   : > { %1024 = vst [vmem:[#allocation5 + $0x8] sm:$0x7] %v1023_v9  ;;  %1030 = vst [vmem:[#allocation5 + $0x10] sm:$0x7] %v1029_v10  ;;  %v1120_v20 = vshrl.u32 %v2727_v59, 16  ;;  %v1124_v21 = vrot.slane %v1122_v13, 1  ;;  %v3182_v36 = vor.u32 %v1084_v16, %v1080_v15 }
 0x110   : > { %v1134_v22 = vshrl.u32 %v2729_v3, 16  ;;  %v1138_v24 = vrot.slane %v1136_v14, 1  ;;  %v1127_v26 = vshrl.u32 %v2728_v11, 16  ;;  %v1131_v27 = vrot.slane %v1129_v18, 1  ;;  %v1038_v61 = vld [vmem:[#allocation4 + $0x6] sm:$0x3] }
 0x111   : > { %v1141_v28 = vshrl.u32 %v2730_v12, 16  ;;  %v1145_v29 = vrot.slane %v1143_v19, 1  ;;  %v1125_v33 = vor.u32 %v1124_v21, %v1120_v20  ;;  %v3180_v35 = vld [vmem:[#allocation3] sm:$0x3]  ;;  %v3187_v46 = vld [vmem:[#allocation4 + $0x2] sm:$0x3] }
 0x112   : > { %v1139_v34 = vor.u32 %v1138_v24, %v1134_v22  ;;  %v1132_v38 = vor.u32 %v1131_v27, %v1127_v26  ;;  %v1037_v47 = vld [vmem:[#allocation4 + $0x4] sm:$0x3]  ;;  %v1212_v55 = vcombine.low %v3182_v36, %v3180_v35  ;;  %v1061_v8 = vld [vmem:[#allocation4 + $0x6] sm:$0x3]  ;;  %v1045_v35 = vld [vmem:[#allocation3 + $0x8] sm:$0x3] }
 0x113   : > { %v1146_v39 = vor.u32 %v1145_v29, %v1141_v28  ;;  %v1228_v44 = vcombine.low %v1047_v6, %v1125_v33  ;;  %v1060_v22 = vld [vmem:[#allocation4 + $0x4] sm:$0x3]  ;;  %v1062_v26 = vld [vmem:[#allocation4 + $0x8] sm:$0x3]  ;;  %v1044_v28 = vld [vmem:[#allocation3 + $0x4] sm:$0x3] }
 0x114   : > { %v1032_v37 = vld [vmem:[#allocation5 + $0x4] sm:$0x3]  ;;  %v1310_v45 = vcombine.low %v1049_v25, %v1139_v34  ;;  %v1269_v49 = vcombine.low %v1048_v31, %v1132_v38 }
 0x115   : > { %v3184_v40 = vld [vmem:[#allocation5 + $0x4] sm:$0x3]  ;;  %v1034_v41 = vld [vmem:[#allocation5 + $0xc] sm:$0x3]  ;;  %v1252_v43 = vcombine.low %v1032_v37, %v1036_v30  ;;  %v1351_v50 = vcombine.low %v1050_v32, %v1146_v39  ;;  %v1236_v57 = vrot.slane %v1228_v44, %v3128_v23  ;;  %v1226_v44 = vrot.slane %v1212_v55, %v3128_v23 }
 0x116   : > { %v1033_v2 = vld [vmem:[#allocation5 + $0x8] sm:$0x3]  ;;  %v1334_v48 = vcombine.low %v1034_v41, %v1038_v61  ;;  %v2736_v53 = vld [vmem:[#allocation5 + $0x4] ss:$0 sps:$4 sm:$0x77]   ;;  %v1229_v56 = vcombine.low %v3184_v40, %v3187_v46  ;;  %v1277_v58 = vrot.slane %v1269_v49, %v3128_v23  ;;  %v1318_v59 = vrot.slane %v1310_v45, %v3128_v23 }
 0x117   : > { %v1260_v51 = vrot.slane %v1252_v43, %v3128_v23  ;;  %v1293_v52 = vcombine.low %v1033_v2, %v1037_v47  ;;  %v2737_v54 = vld [vmem:[#allocation5 + $0x8] ss:$0 sps:$4 sm:$0x77]   ;;  %v1359_v60 = vrot.slane %v1351_v50, %v3128_v23  ;;  %v2738_v62 = vld [vmem:[#allocation5 + $0xc] ss:$0 sps:$4 sm:$0x77]  }
 0x118   : > { %v1057_v63 = vld [vmem:[#allocation5 + $0xc] sm:$0x3]  ;;  %v1342_v3 = vrot.slane %v1334_v48, %v3128_v23  ;;  %v1089_v5 = vshll.u32 %v2736_v53, 16  ;;  %v1056_v7 = vld [vmem:[#allocation5 + $0x8] sm:$0x3]  ;;  %v2360_v9 = vcombine.low %v1236_v57, %v1277_v58  ;;  %v1087_v11 = vshrl.u32 %v2736_v53, 16 }
 0x119   : > { %v1301_v0 = vrot.slane %v1293_v52, %v3128_v23  ;;  %v2356_v4 = vcombine.low %v1219_v42, %v1260_v51  ;;  %v2362_v10 = vcombine.low %v1318_v59, %v1359_v60  ;;  %v1096_v12 = vshll.u32 %v2737_v54, 16  ;;  %v1058_v13 = vld [vmem:[#allocation5 + $0x10] sm:$0x3]  ;;  %v2726_v34 = vld [vmem:[%s3463_s4 + $0x100] sm:$0xff]   ;;  %v2732_v37 = vld [vmem:[%s3463_s4 + $0x148] sm:$0xff]  }
 0x11a   : > { %v1091_v15 = vrot.slane %v1089_v5, 1  ;;  %v1094_v16 = vshrl.u32 %v2737_v54, 16  ;;  %v1311_v17 = vcombine.low %v1057_v63, %v1061_v8  ;;  %v3202_v19 = vrot.slane %v2360_v9, %v3128_v23  ;;  %v1046_v43 = vld [vmem:[#allocation3 + $0xc] sm:$0x3]  ;;  %v2734_v49 = vld [vmem:[%s3463_s4 + $0x108] sm:$0xff]   ;;  %v2745_v5 = vld [vmem:[%s3463_s4 + $0x118] sm:$0xff]  }
 0x11b   : > { %v2358_v14 = vcombine.low %v1301_v0, %v1342_v3  ;;  %v1385_v18 = vrot.slane %v2356_v4, %v3128_v23  ;;  %v1098_v20 = vrot.slane %v1096_v12, 1  ;;  %v1103_v21 = vshll.u32 %v2738_v62, 16  ;;  %v2739_v52 = vld [vmem:[%s3463_s4 + $0x150] sm:$0xff]   ;;  %v2742_v3 = vld [vmem:[%s3463_s4 + $0x180] sm:$0xff]   ;;  %v2744_v4 = vld [vmem:[%s3463_s4 + $0x1c8] sm:$0xff]  }
 0x11c   : > { %v3206_v6 = vrot.slane %v2362_v10, %v3128_v23  ;;  %v1092_v25 = vor.u32 %v1091_v15, %v1087_v11  ;;  %v1270_v27 = vcombine.low %v1056_v7, %v1060_v22  ;;  %v1101_v30 = vshrl.u32 %v2738_v62, 16  ;;  %v2743_v62 = vld [vmem:[%s3463_s4 + $0x158] sm:$0xff]   ;;  %v2747_v8 = vld [vmem:[%s3463_s4 + $0x160] sm:$0xff]   ;;  %v2746_v9 = vld [vmem:[%s3463_s4 + $0x188] sm:$0xff]  }
 0x11d   : > { %v1399_v24 = vrot.slane %v2358_v14, %v3128_v23  ;;  %v1099_v29 = vor.u32 %v1098_v20, %v1094_v16  ;;  %v1105_v61 = vrot.slane %v1103_v21, 1  ;;  %v1352_v31 = vcombine.low %v1058_v13, %v1062_v26  ;;  %v2748_v10 = vld [vmem:[%s3463_s4 + $0x1d0] sm:$0xff]   ;;  %v2749_v11 = vld [vmem:[%s3463_s4 + $0x120] sm:$0xff]   ;;  %v2751_v12 = vld [vmem:[%s3463_s4 + $0x168] sm:$0xff]  }
 0x11e   : > { %v1253_v36 = vcombine.low %v1092_v25, %v1044_v28  ;;  %v1284_v40 = vrot.slane %v1270_v27, %v3128_v23  ;;  %v1444_v42 = vcombine.high %v3202_v19, %v3206_v6  ;;  %v1243_v47 = vrot.slane %v1229_v56, %v3128_v23  ;;  %v2741_v56 = vld [vmem:[%s3463_s4 + $0x110] sm:$0xff]   ;;  %v2752_v14 = vld [vmem:[%s3463_s4 + $0x1d8] sm:$0xff]   ;;  %v2753_v15 = vld [vmem:[%s3463_s4 + $0x128] sm:$0xff]  }
 0x11f   : > { %v1408_v32 = vcombine.high %v1385_v18, %v1399_v24  ;;  %v1407_v33 = vcombine.low %v1385_v18, %v1399_v24  ;;  %v1106_v38 = vor.u32 %v1105_v61, %v1101_v30  ;;  %v1294_v39 = vcombine.low %v1099_v29, %v1045_v35  ;;  %v2750_v13 = vld [vmem:[%s3463_s4 + $0x190] sm:$0xff]   ;;  %v2756_v18 = vld [vmem:[%s3463_s4 + $0x1e0] sm:$0xff]   ;;  %v2759_v21 = vld [vmem:[%s3463_s4 + $0x178] sm:$0xff]  }
 0x120   : > { %v1366_v41 = vrot.slane %v1352_v31, %v3128_v23  ;;  %v1267_v45 = vrot.slane %v1253_v36, %v3128_v23  ;;  %v1325_v48 = vrot.slane %v1311_v17, %v3128_v23  ;;  %v2361_v53 = vcombine.low %v1243_v47, %v1284_v40  ;;  %v2755_v16 = vld [vmem:[%s3463_s4 + $0x170] sm:$0xff]   ;;  %v2754_v17 = vld [vmem:[%s3463_s4 + $0x198] sm:$0xff]   ;;  %v2758_v22 = vld [vmem:[%s3463_s4 + $0x1a0] sm:$0xff]  }
 0x121   : > { %1937 = vmatprep.mubr.bf16.mxu0 %v1408_v32  ;;  %v1308_v46 = vrot.slane %v1294_v39, %v3128_v23  ;;  %v1335_v2 = vcombine.low %v1106_v38, %v1046_v43  ;;  %v2757_v20 = vld [vmem:[%s3463_s4 + $0x130] sm:$0xff]   ;;  %v2760_v24 = vld [vmem:[%s3463_s4 + $0x1e8] sm:$0xff]   ;;  %v2761_v25 = vld [vmem:[%s3463_s4 + $0x138] sm:$0xff]   ;;  %v1443_v29 = vcombine.low %v3202_v19, %v3206_v6 }
 0x122   : > { %1938 = vmatmul.mubr.bf16.vlgmr.msra.gmra.mrb[8].mxu0 %v1407_v33  ;;  %v2357_v51 = vcombine.low %v1226_v44, %v1267_v45  ;;  %v2363_v54 = vcombine.low %v1325_v48, %v1366_v41  ;;  %v3236_v59 = vrot.slane %v2361_v53, %v3128_v23  ;;  %v2762_v26 = vld [vmem:[%s3463_s4 + $0x1a8] sm:$0xff]   ;;  %v2763_v27 = vld [vmem:[%s3463_s4 + $0x1f0] sm:$0xff]   ;;  %v2765_v28 = vld [vmem:[%s3463_s4 + $0x200] sm:$0xff]  }
 0x123   : > { %2511 = vmatpush3.bf16.msra.mxu0 %v2726_v34  ;;  %2019 = vmatprep.mubr.bf16.mxu0 %v1444_v42  ;;  %v1349_v50 = vrot.slane %v1335_v2, %v3128_v23  ;;  %v2764_v30 = vld [vmem:[%s3463_s4 + $0x1b0] sm:$0xff]   ;;  %v2766_v61 = vld [vmem:[%s3463_s4 + $0x1f8] sm:$0xff]   ;;  %v2768_v31 = vld [vmem:[%s3463_s4 + $0x208] sm:$0xff]  }
 0x124   : > { %2512 = vmatprep.subr.bf16.mxu0 %v2732_v37  ;;  %v1392_v57 = vrot.slane %v2357_v51, %v3128_v23  ;;  %v3239_v60 = vrot.slane %v2363_v54, %v3128_v23  ;;  %v2776_v19 = vld [vmem:[#allocation5 + $0x8] ss:$0 sps:$4 sm:$0x77]   ;;  %v2778_v6 = vld [vmem:[#allocation5 + $0x10] ss:$0 sps:$4 sm:$0x77]  }
 0x125   : > { %v2359_v55 = vcombine.low %v1308_v46, %v1349_v50  ;;  %v2767_v32 = vld [vmem:[%s3463_s4 + $0x1b8] sm:$0xff]   ;;  %v2775_v33 = vld [vmem:[#allocation5 + $0x4] ss:$0 sps:$4 sm:$0x77]   ;;  %v2769_v35 = vld [vmem:[%s3463_s4 + $0x210] sm:$0xff]   ;;  %v1169_v36 = vshll.u32 %v2776_v19, 16 }
 0x126   : > { %v1446_v7 = vcombine.high %v3236_v59, %v3239_v60  ;;  %v2777_v34 = vld [vmem:[#allocation5 + $0xc] ss:$0 sps:$4 sm:$0x77]   ;;  %v1183_v37 = vshll.u32 %v2778_v6, 16  ;;  %v1162_v38 = vshll.u32 %v2775_v33, 16  ;;  %v1445_v40 = vcombine.low %v3236_v59, %v3239_v60  ;;  %v2770_v41 = vld [vmem:[%s3463_s4 + $0x218] sm:$0xff]  }
 0x127   : > { %2513 = vmatpush3.bf16.msra.mxu0 %v2734_v49  ;;  %v1406_v58 = vrot.slane %v2359_v55, %v3128_v23  ;;  %v1176_v39 = vshll.u32 %v2777_v34, 16  ;;  %v1171_v42 = vrot.slane %v1169_v36, 1  ;;  %v1167_v45 = vshrl.u32 %v2776_v19, 16  ;;  %v2771_v47 = vld [vmem:[%s3463_s4 + $0x220] sm:$0xff]   ;;  %v2772_v54 = vld [vmem:[%s3463_s4 + $0x228] sm:$0xff]   ;;  %v2773_v59 = vld [vmem:[%s3463_s4 + $0x230] sm:$0xff]  }
 0x128   : > { %2514 = vmatprep.subr.bf16.mxu0 %v2739_v52  ;;  %v1185_v43 = vrot.slane %v1183_v37, 1  ;;  %v1164_v44 = vrot.slane %v1162_v38, 1  ;;  %v1181_v2 = vshrl.u32 %v2778_v6, 16  ;;  %v1160_v48 = vshrl.u32 %v2775_v33, 16 }
 0x129   : > { %v1410_v63 = vcombine.high %v1392_v57, %v1406_v58  ;;  %v1409_v0 = vcombine.low %v1392_v57, %v1406_v58  ;;  %v1178_v46 = vrot.slane %v1176_v39, 1  ;;  %v1172_v49 = vor.u32 %v1171_v42, %v1167_v45  ;;  %v2437_v45 = vld [vmem:[%s3465_s6] ss:$0 sm:$0xff] }
 0x12a   : > { %v1174_v50 = vshrl.u32 %v2777_v34, 16  ;;  %v1186_v51 = vor.u32 %v1185_v43, %v1181_v2  ;;  %v1165_v52 = vor.u32 %v1164_v44, %v1160_v48 }
 0x12b   : > { %2515 = vmatpush3.bf16.msra.mxu0 %v2741_v56  ;;  %1978 = vmatprep.mubr.bf16.mxu1 %v1410_v63  ;;  %v1292_v55 = vrot.slane %v1172_v49, %v3128_v23  ;;  %v2774_v63 = vld [vmem:[%s3463_s4 + $0x238] sm:$0xff]  }
 0x12c   : > { %2516 = vmatprep.subr.bf16.mxu0 %v2743_v62  ;;  %1979 = vmatmul.mubr.bf16.vlgmr.msra.gmra.mrb[8].mxu1 %v1409_v0  ;;  %v1179_v53 = vor.u32 %v1178_v46, %v1174_v50  ;;  %v1374_v56 = vrot.slane %v1186_v51, %v3128_v23  ;;  %v1251_v57 = vrot.slane %v1165_v52, %v3128_v23 }
 0x12d   : > { %2533 = vmatpush3.bf16.msra.mxu1 %v2742_v3  ;;  %2060 = vmatprep.mubr.bf16.mxu1 %v1446_v7  ;;  %v2780_v7 = vld [vmem:[%s3466_s7 + $0x8] sm:$0xff]  }
 0x12e   : > { %2534 = vmatprep.subr.bf16.mxu1 %v2744_v4  ;;  %v1333_v58 = vrot.slane %v1179_v53, %v3128_v23  ;;  %v1447_v60 = vcombine.low %v1251_v57, %v1292_v55  ;;  %v2438_v55 = vld [vmem:[%s3467_s8] ss:$0 sm:$0xff] }
 0x12f   : > { %2517 = vmatpush3.bf16.msra.mxu0 %v2745_v5  ;;  %v2779_v5 = vld [vmem:[%s3466_s7] sm:$0xff]  }
 0x130   : > { %2518 = vmatprep.subr.bf16.mxu0 %v2747_v8  ;;  %v1448_v62 = vcombine.low %v1333_v58, %v1374_v56  ;;  %v1455_v0 = vrot.slane %v1447_v60, %v3128_v23  ;;  %v2781_v8 = vld [vmem:[%s3466_s7 + $0x10] sm:$0xff]  }
 0x131   : > { %2535 = vmatpush3.bf16.msra.mxu1 %v2746_v9  ;;  %v2783_v9 = vld [vmem:[%s3466_s7 + $0x20] sm:$0xff]  }
 0x132   : > { %2536 = vmatprep.subr.bf16.mxu1 %v2748_v10  ;;  %v1462_v3 = vrot.slane %v1448_v62, %v3128_v23  ;;  %v2782_v23 = vld [vmem:[%s3466_s7 + $0x18] sm:$0xff]   ;;  %v2784_v10 = vld [vmem:[%s3466_s7 + $0x28] sm:$0xff]  }
 0x133   : > { %2519 = vmatpush3.bf16.msra.mxu0 %v2749_v11  ;;  %v2785_v11 = vld [vmem:[%s3466_s7 + $0x30] sm:$0xff]  }
 0x134   : > { %2520 = vmatprep.subr.bf16.mxu0 %v2751_v12  ;;  %v1463_v4 = vcombine.low %v1455_v0, %v1462_v3  ;;  %v2786_v12 = vld [vmem:[%s3466_s7 + $0x38] sm:$0xff]  }
 0x135   : > { %2537 = vmatpush3.bf16.msra.mxu1 %v2750_v13 }
 0x136   : > { %2538 = vmatprep.subr.bf16.mxu1 %v2752_v14 }
 0x137   : > { %2521 = vmatpush3.bf16.msra.mxu0 %v2753_v15 }
 0x138   : > { %2522 = vmatprep.subr.bf16.mxu0 %v2755_v16 }
 0x139   : > { %2539 = vmatpush3.bf16.msra.mxu1 %v2754_v17 }
 0x13a   : > { %2540 = vmatprep.subr.bf16.mxu1 %v2756_v18 }
 0x13b   : > { %2523 = vmatpush3.bf16.msra.mxu0 %v2757_v20 }
 0x13c   : > { %2524 = vmatprep.subr.bf16.mxu0 %v2759_v21 }
 0x13d   : > { %2541 = vmatpush3.bf16.msra.mxu1 %v2758_v22 }
 0x13e   : > { %2542 = vmatprep.subr.bf16.mxu1 %v2760_v24 }
 0x13f   : > { %2525 = vmatpush3.bf16.msra.mxu0 %v2761_v25 }
 0x140   : > { %2604 = vmatprep.subr.bf16.mxu0 %v2851_v1 }
 0x141   : > { %2543 = vmatpush3.bf16.msra.mxu1 %v2762_v26 }
 0x142   : > { %2020 = vmatmul.mubr.bf16.vlgmr.msra.gmra.mrb[12].mxu0 %v1443_v29  ;;  %2544 = vmatprep.subr.bf16.mxu1 %v2763_v27 }
 0x143   : > { %2605 = vmatpush3.bf16.msra.mxu0 %v2765_v28  ;;  %2620 = vmatprep.mubr.msk.bf16.mxu0 %vm2852_vm0, %v2851_v1 }
 0x144   : > { %2606 = vmatprep.subr.bf16.mxu0 %v2851_v1 }
 0x145   : > { %2545 = vmatpush3.bf16.msra.mxu1 %v2764_v30 }
 0x146   : > { %2546 = vmatprep.subr.bf16.mxu1 %v2766_v61 }
 0x147   : > { %2607 = vmatpush3.bf16.msra.mxu0 %v2768_v31 }
 0x148   : > { %2608 = vmatprep.subr.bf16.mxu0 %v2851_v1 }
 0x149   : > { %2547 = vmatpush3.bf16.msra.mxu1 %v2767_v32 }
 0x14a   : > { %2624 = vmatprep.subr.bf16.mxu1 %v2851_v1 }
 0x14b   : > { %2609 = vmatpush3.bf16.msra.mxu0 %v2769_v35 }
 0x14c   : > { %2610 = vmatprep.subr.bf16.mxu0 %v2851_v1  ;;  %2061 = vmatmul.mubr.bf16.vlgmr.msra.gmra.mrb[12].mxu1 %v1445_v40 }
 0x14d   : > { %2640 = vmatprep.mubr.msk.bf16.mxu1 %vm2852_vm0, %v2851_v1  ;;  %2625 = vmatpush3.bf16.msra.mxu1 %v2779_v5 }
 0x14e   : > { %2626 = vmatprep.subr.bf16.mxu1 %v2851_v1 }
 0x14f   : > { %2611 = vmatpush3.bf16.msra.mxu0 %v2770_v41  ;;  %v2436_v41 = vld [vmem:[%s3464_s5] ss:$0 sm:$0xff] }
 0x150   : > { %2612 = vmatprep.subr.bf16.mxu0 %v2851_v1 }
 0x151   : > { %2627 = vmatpush3.bf16.msra.mxu1 %v2780_v7 }
 0x152   : > { %2628 = vmatprep.subr.bf16.mxu1 %v2851_v1 }
 0x153   : > { %2613 = vmatpush3.bf16.msra.mxu0 %v2771_v47 }
 0x154   : > { %2614 = vmatprep.subr.bf16.mxu0 %v2851_v1 }
 0x155   : > { %2629 = vmatpush3.bf16.msra.mxu1 %v2781_v8 }
 0x156   : > { %2630 = vmatprep.subr.bf16.mxu1 %v2851_v1 }
 0x157   : > { %2615 = vmatpush3.bf16.msra.mxu0 %v2772_v54 }
 0x158   : > { %2616 = vmatprep.subr.bf16.mxu0 %v2851_v1 }
 0x159   : > { %2631 = vmatpush3.bf16.msra.mxu1 %v2782_v23 }
 0x15a   : > { %2632 = vmatprep.subr.bf16.mxu1 %v2851_v1 }
 0x15b   : > { %2617 = vmatpush3.bf16.msra.mxu0 %v2773_v59 }
 0x15c   : > { %2618 = vmatprep.subr.bf16.mxu0 %v2851_v1 }
 0x15d   : > { %2633 = vmatpush3.bf16.msra.mxu1 %v2783_v9 }
 0x15e   : > { %2634 = vmatprep.subr.bf16.mxu1 %v2851_v1 }
 0x15f   : > { %2619 = vmatpush3.bf16.msra.mxu0 %v2774_v63 }
 0x161   : > { %2635 = vmatpush3.bf16.msra.mxu1 %v2784_v10 }
 0x162   : > { %2621 = vmatmul.mubr.bf16.vlgmr.msra.gmra.mrb[16].mxu0 %v1463_v4  ;;  %2636 = vmatprep.subr.bf16.mxu1 %v2851_v1 }
 0x165   : > { %2637 = vmatpush3.bf16.msra.mxu1 %v2785_v11 }
 0x166   : > { %2638 = vmatprep.subr.bf16.mxu1 %v2851_v1 }
 0x169   : > { %2639 = vmatpush3.bf16.msra.mxu1 %v2786_v12 }
 0x1f5   : > { %v2482_v13 = vpop.f32.mrb[8].mxu0 }
 0x1f6   : > { %v2483_v14 = vpop.f32.mrb[9].mxu0 }
 0x1f7   : > { %v2484_v15 = vadd.f32 %v2483_v14, %v2482_v13  ;;  %v2485_v16 = vpop.f32.mrb[10].mxu0 }
 0x1f8   : > { %v2486_v17 = vpop.f32.mrb[11].mxu0 }
 0x1f9   : > { %v2487_v18 = vadd.f32 %v2486_v17, %v2485_v16 }
 0x1ff   : > { %v2504_v20 = vpop.f32.mrb[8].mxu1 }
 0x200   : > { %v2505_v21 = vpop.f32.mrb[9].mxu1 }
 0x201   : > { %v2506_v22 = vadd.f32 %v2505_v21, %v2504_v20  ;;  %v2507_v24 = vpop.f32.mrb[10].mxu1 }
 0x202   : > { %v2508_v25 = vpop.f32.mrb[11].mxu1 }
 0x203   : > { %v1981_v26 = vadd.f32 %v2506_v22, %v2484_v15  ;;  %v2509_v27 = vadd.f32 %v2508_v25, %v2507_v24 }
 0x205   : > { %v1984_v28 = vadd.f32 %v2509_v27, %v2487_v18 }
 0x215   : > { %v2526_v29 = vpop.f32.mrb[12].mxu0 }
 0x216   : > { %v2527_v30 = vpop.f32.mrb[13].mxu0 }
 0x217   : > { %v2528_v61 = vadd.f32 %v2527_v30, %v2526_v29  ;;  %v2529_v31 = vpop.f32.mrb[14].mxu0 }
 0x218   : > { %v2530_v1 = vpop.f32.mrb[15].mxu0 }
 0x219   : > { %v2022_v19 = vadd.f32 %v2528_v61, %v1981_v26  ;;  %v2531_v6 = vadd.f32 %v2530_v1, %v2529_v31 }
 0x21b   : > { %v2025_v32 = vadd.f32 %v2531_v6, %v1984_v28 }
 0x21f   : > { %v2548_v33 = vpop.f32.mrb[12].mxu1 }
 0x220   : > { %v2549_v34 = vpop.f32.mrb[13].mxu1 }
 0x221   : > { %v2550_v35 = vadd.f32 %v2549_v34, %v2548_v33  ;;  %v2551_v36 = vpop.f32.mrb[14].mxu1 }
 0x222   : > { %v2552_v37 = vpop.f32.mrb[15].mxu1 }
 0x223   : > { %v2553_v38 = vadd.f32 %v2552_v37, %v2551_v36  ;;  %v2063_v39 = vadd.f32 %v2550_v35, %v2022_v19 }
 0x225   : > { %v2066_v40 = vadd.f32 %v2553_v38, %v2025_v32 }
 0x235   : > { %v2103_v42 = vpop.f32.mrb[16].mxu0 }
 0x236   : > { %v2104_v43 = vadd.f32 %v2103_v42, %v2063_v39  ;;  %v2622_v44 = vpop.f32.mrb[17].mxu0 }
 0x237   : > { %v2106_v46 = vpop.f32.mrb[18].mxu0 }
 0x238   : > { %v2116_v2 = vmul.f32 %v2436_v41, %v2104_v43  ;;  %v2107_v47 = vadd.f32 %v2106_v46, %v2066_v40  ;;  %v2623_v48 = vpop.f32.mrb[19].mxu0 }
 0x23a   : > { %v2124_v49 = vadd.f32 %v2437_v45, %v2116_v2  ;;  %v2117_v50 = vmul.f32 %v2436_v41, %v2107_v47 }
 0x23c   : > { %v2125_v51 = vadd.f32 %v2437_v45, %v2117_v50  ;;  %v2126_v52 = vmax.f32 %v2124_v49, 0.0 }
 0x23e   : > { %v2127_v53 = vmax.f32 %v2125_v51, 0.0 }
 0x240   : > { %v2128_v54 = vpack.c.bf16 %v2127_v53, %v2126_v52 }
 0x242   : > { %2641 = vmatmul.mubr.bf16.vlgmr.msra.gmra.mrb[16].mxu1 %v2128_v54 }
 0x315   : > { %v2217_v56 = vpop.f32.mrb[16].mxu1 }
 0x316   : > { %v2218_v57 = vadd.f32 %v2438_v55, %v2217_v56  ;;  %v2642_v58 = vpop.f32.mrb[17].mxu1 }
 0x317   : > { %v2220_v59 = vpop.f32.mrb[18].mxu1 }
 0x318   : > { %v2226_v60 = vcombine.high %v2218_v57, %v2218_v57  ;;  %2231 = vst.msk [vmem:[%s325_s22] sm:$0xf] %vm2230_vm10, %v2218_v57  ;;  %v2221_v62 = vadd.f32 %v2438_v55, %v2220_v59  ;;  %v2643_v63 = vpop.f32.mrb[19].mxu1 }
 0x31a   : > { %2232 = vst.msk [vmem:[%s325_s22 + $0x4] sm:$0xf] %vm2230_vm10, %v2226_v60  ;;  %v2227_v0 = vcombine.high %v2221_v62, %v2221_v62  ;;  %2233 = vst.msk [vmem:[%s325_s22 + $0x8] sm:$0xf] %vm2230_vm10, %v2221_v62 }
 0x31c   : > { %2234 = vst.msk [vmem:[%s325_s22 + $0xc] sm:$0xf] %vm2230_vm10, %v2227_v0 }
 0x31d   : > { %2800 = shalt.err (!%p2797_p3)
}
 0x31e   : > { %s2801_s14 = scalar_lea.hbm %s3415_s27, 256  ;;  %s2805_s24 = scalar_lea.hbm %s3468_s9, 512 }
 0x31f   : > { %p2802_p4 = scmp.ne.s32.totalorder %s3415_s27, %s2801_s14  ;;  %p2806_p9 = scmp.lt.u32.totalorder %s3415_s27, %s3468_s9 }
 0x320   : > { %p2807_p10 = scmp.lt.u32.totalorder %s2805_s24, %s2801_s14  ;;  %p2809_p12 = scmp.lt.u32.totalorder %s2801_s14, %s3415_s27 }
 0x321   : > { %p2803_p7 = pnand %p2802_p4, %p2946_p5 }
 0x322   : > { %p2808_p11 = por %p2807_p10, %p2806_p9 }
 0x323   : > { %p2804_p8 = pneg %p2803_p7 }
 0x324   : > { %p2810_p13 = por %p2809_p12, %p2808_p11 }
 0x326   : > { %p2811_p0 = pnand %p2810_p13, %p2804_p8 }
 0x328   : > { %2814 = shalt.err (!%p2811_p0)
}
 0x329   : > { %s2856_s28 = smov 64   ;;  %s2857_s29 = smov 4  }
 0x32a   : > { %2644 = dma.vmem_to_hbm [thread:$0]  (%p2946_p5), %s3408_s23, 256, %s3415_s27, %s3418_s13, %s2856_s28, %s2856_s28, %s2857_s29  }
 0x32b PF: > { %p2650_p1 = scmp.ge.s32.totalorder %s2849_s12, 2  ;;  %s2264_s16 = sand.u32 1, %s2837_s30  }
 0x32c   : > { %s2265_s17 = scalar_lea.sflag [#allocation7], %s2264_s16 }
 0x32d   : > { %p2647_p2 = pnand %p2650_p1, %p2950_p6 }
 0x32f   : > { %2832 = dma.done.wait (!%p2647_p2), %s2265_s17, 256  }
 0x330   : > { %2834 = vsyncadd (!%p2647_p2), %s2265_s17, 4294967040  ;;  %p19_p3 = scmp.ge.s32.totalorder %s2933_s15, 4   ;;  %s3475_s30 = smov %s2841_s10 }
 0x331   : > { %s3476_s10 = smov %s2845_s11  ;;  %s3477_s11 = smov %s2944_s18 }
 0x332   : > { %s3478_s12 = smov %s2933_s15  ;;  %21 = sbr.rel (!%p19_p3) target bundleno = 3 (0x3), region = 96 }
 0x339   :  { %2270 = vsyncpa [#allocation7], 1 }
 0x33a   :  { %2272 = vsyncpa [#allocation7 + $0x1], 1 }

</bundles_post_ra>
